<compile_context>
chip_gen: v7x
topology: tpu7x:2x2x1
jax: 0.10.0
libtpu: 0.0.40
codegen_flags: <defaults>
</compile_context>

<pallas_src>
import jax
import jax.numpy as jnp
from jax.experimental import pallas as pl
from jax.experimental.pallas import tpu as pltpu

# TODO(synk): len(Carla_env.actions) is not available here; n_actions fixed to 9.
N_ACTIONS = 9
HEAD_PAD = 128          # lane-dense padded head width
M_FEATURES = 15         # raw measurement features
M_PAD = 16              # padded (sublane-friendly) measurement features
X_FEATURES = 512        # x.view(B, -1) must flatten to 512 (so the concat is 1024)
TB_MAX = 512            # batch-tile cap (keeps VMEM well under v5e's 16 MiB default)


def _round_up(n, k):
    return (n + k - 1) // k * k


def _choose_tb(batch):
    """Pick the batch tile size.

    - multiples of 16 (bf16 sublane packing); 256/128 multiples when large so
      MXU M-dimension passes are full on v6e/v5e,
    - >= 2 grid tiles once batch >= 32 so v7x's two TensorCores both get work
      (splitting tinier batches is pure per-tile overhead),
    - capped at TB_MAX=512: big enough to sit near the HBM roofline while the
      whole working set stays a few MiB (no vmem_limit_bytes needed anywhere).
    """
    if batch < 32:
        return _round_up(batch, 16)
    half = -(-batch // 2)                   # ceil(batch / 2)
    if half >= 256:
        tb = _round_up(half, 256)
    elif half >= 128:
        tb = _round_up(half, 128)
    else:
        tb = _round_up(half, 16)
    return min(TB_MAX, tb)


def net_kernel(x_ref, m_ref,
               w1_ref, b1_ref, w2_ref, b2_ref, w3_ref, b3_ref,
               w4a_ref, w4b_ref, b4_ref, wh_ref, bh_ref,
               out_ref):
    f32 = jnp.float32
    bf16 = jnp.bfloat16

    # fc_backbone on m (w1/w2 zero-padded to aligned tiles; math unchanged).
    # All dots are bf16 x bf16 on the MXU with f32 accumulation.
    m = m_ref[...].astype(bf16)                                        # [TB, 16]
    h = jnp.dot(m, w1_ref[...], preferred_element_type=f32) + b1_ref[...]
    h = jnp.maximum(h, 0.0)                                            # [TB, 128] f32
    h = jnp.dot(h.astype(bf16), w2_ref[...],
                preferred_element_type=f32) + b2_ref[...]
    h = jnp.maximum(h, 0.0)                                            # [TB, 256] f32
    x_v = jnp.dot(h.astype(bf16), w3_ref[...],
                  preferred_element_type=f32) + b3_ref[...]
    x_v = jnp.maximum(x_v, 0.0)                                        # [TB, 512] f32

    x = x_ref[...]                                                     # [TB, 512] bf16

    # fc4(cat([x, x_v], -1)) == x @ W4[:512] + x_v @ W4[512:]  (+ b4)
    h4 = (jnp.dot(x, w4a_ref[...], preferred_element_type=f32)
          + jnp.dot(x_v.astype(bf16), w4b_ref[...], preferred_element_type=f32)
          + b4_ref[...])
    h4 = jnp.maximum(h4, 0.0)                                          # [TB, 512] f32

    # head, padded to 128 lanes (unmasked stores); wrapper slices [:, :n_actions]
    out = jnp.dot(h4.astype(bf16), wh_ref[...],
                  preferred_element_type=f32) + bh_ref[...]
    out_ref[...] = out.astype(out_ref.dtype)                           # [TB, 128] f32


def net_forward(x, m, params, n_actions=N_ACTIONS):
    B = x.shape[0]
    x2 = x.reshape(B, -1)                               # x.view(size, -1) -> [B, 512]
    m2 = m.reshape(B, -1)                               # m.float()        -> [B, 15]
    assert x2.shape[1] == X_FEATURES, "x must flatten to 512 features per row"
    assert m2.shape[1] == M_FEATURES, "m must flatten to 15 features per row"

    TB = _choose_tb(B)
    Bp = _round_up(B, TB)
    n_tiles = Bp // TB

    # x streamed as bf16 (kernel rounds it to bf16 anyway): halves its DMA and
    # any pad copy.  At most one pad materialization per input.
    x2 = x2.astype(jnp.bfloat16)
    if Bp != B:
        x2 = jnp.pad(x2, ((0, Bp - B), (0, 0)))
    # m: a single pad covers both the 15->16 feature pad and the batch pad.
    m2 = jnp.pad(m2.astype(jnp.float32),
                 ((0, Bp - B), (0, M_PAD - M_FEATURES)))

    weights = (params["w1"], params["b1"], params["w2"], params["b2"],
               params["w3"], params["b3"],
               params["w4a"], params["w4b"], params["b4"],
               params["wh"], params["bh"])

    act_spec = lambda feat: pl.BlockSpec((TB, feat), lambda i: (i, 0))
    # constant block index -> weights fetched once, VMEM-resident across tiles
    weight_specs = [pl.BlockSpec(w.shape, lambda i: (0, 0)) for w in weights]

    out = pl.pallas_call(
        net_kernel,
        out_shape=jax.ShapeDtypeStruct((Bp, HEAD_PAD), jnp.float32),
        grid=(n_tiles,),
        in_specs=[act_spec(X_FEATURES), act_spec(M_PAD)] + weight_specs,
        out_specs=pl.BlockSpec((TB, HEAD_PAD), lambda i: (i, 0)),
        compiler_params=pltpu.CompilerParams(
            dimension_semantics=("parallel",)),
    )(x2, m2, *weights)

    return out[:B, :n_actions]


def init_params(key, n_actions=N_ACTIONS):
    """nn.Linear-default init U(-1/sqrt(fan_in), 1/sqrt(fan_in)), stored [in, out],
    zero-padded to TPU-friendly tiles; all weights bf16, biases f32."""
    def linear(k, fan_in, fan_out):
        k1, k2 = jax.random.split(k)
        bound = 1.0 / float(fan_in) ** 0.5
        w = jax.random.uniform(k1, (fan_in, fan_out), jnp.float32, -bound, bound)
        b = jax.random.uniform(k2, (1, fan_out), jnp.float32, -bound, bound)
        return w, b

    keys = jax.random.split(key, 5)
    w1, b1 = linear(keys[0], 15, 4)
    w2, b2 = linear(keys[1], 4, 512 // 2)
    w3, b3 = linear(keys[2], 512 // 2, 512)
    w4, b4 = linear(keys[3], 1024, 512)
    wh, bh = linear(keys[4], 512, n_actions)

    # zero-pad tiny layers to aligned tiles (padded rows/cols contribute nothing)
    w1p = jnp.zeros((M_PAD, 128), jnp.float32).at[:15, :4].set(w1)
    b1p = jnp.zeros((1, 128), jnp.float32).at[:, :4].set(b1)
    w2p = jnp.zeros((128, 256), jnp.float32).at[:4, :].set(w2)
    # zero-pad the head to 128 lane-dense output columns
    whp = jnp.zeros((512, HEAD_PAD), jnp.float32).at[:, :n_actions].set(wh)
    bhp = jnp.zeros((1, HEAD_PAD), jnp.float32).at[:, :n_actions].set(bh)

    bf16 = jnp.bfloat16
    return dict(
        w1=w1p.astype(bf16), b1=b1p, w2=w2p.astype(bf16), b2=b2,
        w3=w3.astype(bf16), b3=b3,
        w4a=w4[:512, :].astype(bf16), w4b=w4[512:, :].astype(bf16), b4=b4,
        wh=whp.astype(bf16), bh=bhp)


def net_forward_ref(x, m, params, n_actions=N_ACTIONS):
    """Plain-JAX reference mirroring the kernel's bf16-weight / bf16-input,
    f32-accumulation matmuls."""
    f32 = jnp.float32

    def bf(a):           # bf16 rounding of MXU inputs, f32 accumulation
        return a.astype(jnp.bfloat16).astype(f32)

    def w(name):
        return params[name].astype(f32)

    B = x.shape[0]
    m2 = jnp.pad(m.reshape(B, -1).astype(f32), ((0, 0), (0, M_PAD - M_FEATURES)))
    h = jnp.maximum(bf(m2) @ w("w1") + params["b1"], 0.0)
    h = jnp.maximum(bf(h) @ w("w2") + params["b2"], 0.0)
    x_v = jnp.maximum(bf(h) @ w("w3") + params["b3"], 0.0)
    x2 = x.reshape(B, -1).astype(f32)
    h4 = jnp.maximum(bf(x2) @ w("w4a") + bf(x_v) @ w("w4b") + params["b4"], 0.0)
    out = bf(h4) @ w("wh") + params["bh"]
    return out[:, :n_actions]


if __name__ == "__main__":
    key = jax.random.PRNGKey(0)
    kp, kx, km = jax.random.split(key, 3)

    params = init_params(kp)
    fwd = jax.jit(net_forward)

    # Small-batch check (single tile).  x flattens to 512 features per row so
    # cat([x, x_v]) -> 1024 = fc4's input dim (8*8*8 = 512).
    B = 2
    x = jax.random.normal(kx, (B, 8, 8, 8), jnp.float32)
    m = jax.random.normal(km, (B, 15), jnp.float32)
    out = jax.block_until_ready(fwd(x, m, params))
    ref = net_forward_ref(x, m, params)
    assert out.shape == (B, N_ACTIONS)
    assert jnp.allclose(out, ref, atol=1e-2, rtol=1e-2), "mismatch vs reference (B=2)"

    # Multi-tile check (exercises batch padding + the 2-way grid split).
    B2 = 70
    x_b = jax.random.normal(kx, (B2, 512), jnp.float32)
    m_b = jax.random.normal(km, (B2, 15), jnp.float32)
    out_b = jax.block_until_ready(fwd(x_b, m_b, params))
    ref_b = net_forward_ref(x_b, m_b, params)
    assert out_b.shape == (B2, N_ACTIONS)
    assert jnp.allclose(out_b, ref_b, atol=1e-2, rtol=1e-2), "mismatch vs reference (B=70)"

    print("KERNEL_OK")
</pallas_src>

<mosaic_0001>
module attributes {stable_mosaic.version = 11 : i64} {
  func.func @net_kernel(%arg0: i32, %arg1: memref<16x512xbf16, #tpu.memory_space<vmem>>, %arg2: memref<16x16xf32, #tpu.memory_space<vmem>>, %arg3: memref<16x128xbf16, #tpu.memory_space<vmem>>, %arg4: memref<1x128xf32, #tpu.memory_space<vmem>>, %arg5: memref<128x256xbf16, #tpu.memory_space<vmem>>, %arg6: memref<1x256xf32, #tpu.memory_space<vmem>>, %arg7: memref<256x512xbf16, #tpu.memory_space<vmem>>, %arg8: memref<1x512xf32, #tpu.memory_space<vmem>>, %arg9: memref<512x512xbf16, #tpu.memory_space<vmem>>, %arg10: memref<512x512xbf16, #tpu.memory_space<vmem>>, %arg11: memref<1x512xf32, #tpu.memory_space<vmem>>, %arg12: memref<512x128xbf16, #tpu.memory_space<vmem>>, %arg13: memref<1x128xf32, #tpu.memory_space<vmem>>, %arg14: memref<16x128xf32, #tpu.memory_space<vmem>>) attributes {dimension_semantics = [#tpu.dimension_semantics<parallel>], iteration_bounds = array<i64: 1>, scalar_prefetch = 0 : i64, scratch_operands = 0 : i64, tpu.core_type = #tpu.core_type<tc>, window_params = [{transform_indices = @transform_0, window_bounds = array<i64: 16, 512>}, {transform_indices = @transform_1, window_bounds = array<i64: 16, 16>}, {pipeline_mode = #tpu.pipeline_mode<synchronous>, transform_indices = @transform_2, window_bounds = array<i64: 16, 128>}, {pipeline_mode = #tpu.pipeline_mode<synchronous>, transform_indices = @transform_3, window_bounds = array<i64: 1, 128>}, {pipeline_mode = #tpu.pipeline_mode<synchronous>, transform_indices = @transform_4, window_bounds = array<i64: 128, 256>}, {pipeline_mode = #tpu.pipeline_mode<synchronous>, transform_indices = @transform_5, window_bounds = array<i64: 1, 256>}, {pipeline_mode = #tpu.pipeline_mode<synchronous>, transform_indices = @transform_6, window_bounds = array<i64: 256, 512>}, {pipeline_mode = #tpu.pipeline_mode<synchronous>, transform_indices = @transform_7, window_bounds = array<i64: 1, 512>}, {pipeline_mode = #tpu.pipeline_mode<synchronous>, transform_indices = @transform_8, window_bounds = array<i64: 512, 512>}, {pipeline_mode = #tpu.pipeline_mode<synchronous>, transform_indices = @transform_9, window_bounds = array<i64: 512, 512>}, {pipeline_mode = #tpu.pipeline_mode<synchronous>, transform_indices = @transform_10, window_bounds = array<i64: 1, 512>}, {pipeline_mode = #tpu.pipeline_mode<synchronous>, transform_indices = @transform_11, window_bounds = array<i64: 512, 128>}, {pipeline_mode = #tpu.pipeline_mode<synchronous>, transform_indices = @transform_12, window_bounds = array<i64: 1, 128>}, {transform_indices = @transform_13, window_bounds = array<i64: 16, 128>}]} {
    %c0 = arith.constant 0 : index
    %c0_0 = arith.constant 0 : index
    %0 = vector.load %arg2[%c0, %c0_0] : memref<16x16xf32, #tpu.memory_space<vmem>>, vector<16x16xf32>
    %1 = arith.truncf %0 : vector<16x16xf32> to vector<16x16xbf16>
    %c0_1 = arith.constant 0 : index
    %c0_2 = arith.constant 0 : index
    %2 = vector.load %arg3[%c0_1, %c0_2] : memref<16x128xbf16, #tpu.memory_space<vmem>>, vector<16x128xbf16>
    %cst = arith.constant dense<0.000000e+00> : vector<16x128xf32>
    %3 = tpu.matmul %1, %2, %cst {dimension_numbers = #tpu.dot_dimension_numbers<[1], [0], [0], [1], [0, 0, 1, 1], [], []>} : vector<16x16xbf16>, vector<16x128xbf16>, vector<16x128xf32> -> vector<16x128xf32>
    %c0_3 = arith.constant 0 : index
    %c0_4 = arith.constant 0 : index
    %4 = vector.load %arg4[%c0_3, %c0_4] : memref<1x128xf32, #tpu.memory_space<vmem>>, vector<1x128xf32>
    %5 = vector.broadcast %4 : vector<1x128xf32> to vector<16x128xf32>
    %6 = arith.addf %3, %5 : vector<16x128xf32>
    %cst_5 = arith.constant 0.000000e+00 : f32
    %7 = vector.broadcast %cst_5 : f32 to vector<16x128xf32>
    %8 = arith.maximumf %6, %7 : vector<16x128xf32>
    %9 = arith.truncf %8 : vector<16x128xf32> to vector<16x128xbf16>
    %c0_6 = arith.constant 0 : index
    %c0_7 = arith.constant 0 : index
    %10 = vector.load %arg5[%c0_6, %c0_7] : memref<128x256xbf16, #tpu.memory_space<vmem>>, vector<128x256xbf16>
    %cst_8 = arith.constant dense<0.000000e+00> : vector<16x256xf32>
    %11 = tpu.matmul %9, %10, %cst_8 {dimension_numbers = #tpu.dot_dimension_numbers<[1], [0], [0], [1], [0, 0, 1, 1], [], []>} : vector<16x128xbf16>, vector<128x256xbf16>, vector<16x256xf32> -> vector<16x256xf32>
    %c0_9 = arith.constant 0 : index
    %c0_10 = arith.constant 0 : index
    %12 = vector.load %arg6[%c0_9, %c0_10] : memref<1x256xf32, #tpu.memory_space<vmem>>, vector<1x256xf32>
    %13 = vector.broadcast %12 : vector<1x256xf32> to vector<16x256xf32>
    %14 = arith.addf %11, %13 : vector<16x256xf32>
    %cst_11 = arith.constant 0.000000e+00 : f32
    %15 = vector.broadcast %cst_11 : f32 to vector<16x256xf32>
    %16 = arith.maximumf %14, %15 : vector<16x256xf32>
    %17 = arith.truncf %16 : vector<16x256xf32> to vector<16x256xbf16>
    %c0_12 = arith.constant 0 : index
    %c0_13 = arith.constant 0 : index
    %18 = vector.load %arg7[%c0_12, %c0_13] : memref<256x512xbf16, #tpu.memory_space<vmem>>, vector<256x512xbf16>
    %cst_14 = arith.constant dense<0.000000e+00> : vector<16x512xf32>
    %19 = tpu.matmul %17, %18, %cst_14 {dimension_numbers = #tpu.dot_dimension_numbers<[1], [0], [0], [1], [0, 0, 1, 1], [], []>} : vector<16x256xbf16>, vector<256x512xbf16>, vector<16x512xf32> -> vector<16x512xf32>
    %c0_15 = arith.constant 0 : index
    %c0_16 = arith.constant 0 : index
    %20 = vector.load %arg8[%c0_15, %c0_16] : memref<1x512xf32, #tpu.memory_space<vmem>>, vector<1x512xf32>
    %21 = vector.broadcast %20 : vector<1x512xf32> to vector<16x512xf32>
    %22 = arith.addf %19, %21 : vector<16x512xf32>
    %cst_17 = arith.constant 0.000000e+00 : f32
    %23 = vector.broadcast %cst_17 : f32 to vector<16x512xf32>
    %24 = arith.maximumf %22, %23 : vector<16x512xf32>
    %c0_18 = arith.constant 0 : index
    %c0_19 = arith.constant 0 : index
    %25 = vector.load %arg1[%c0_18, %c0_19] : memref<16x512xbf16, #tpu.memory_space<vmem>>, vector<16x512xbf16>
    %c0_20 = arith.constant 0 : index
    %c0_21 = arith.constant 0 : index
    %26 = vector.load %arg9[%c0_20, %c0_21] : memref<512x512xbf16, #tpu.memory_space<vmem>>, vector<512x512xbf16>
    %cst_22 = arith.constant dense<0.000000e+00> : vector<16x512xf32>
    %27 = tpu.matmul %25, %26, %cst_22 {dimension_numbers = #tpu.dot_dimension_numbers<[1], [0], [0], [1], [0, 0, 1, 1], [], []>} : vector<16x512xbf16>, vector<512x512xbf16>, vector<16x512xf32> -> vector<16x512xf32>
    %28 = arith.truncf %24 : vector<16x512xf32> to vector<16x512xbf16>
    %c0_23 = arith.constant 0 : index
    %c0_24 = arith.constant 0 : index
    %29 = vector.load %arg10[%c0_23, %c0_24] : memref<512x512xbf16, #tpu.memory_space<vmem>>, vector<512x512xbf16>
    %cst_25 = arith.constant dense<0.000000e+00> : vector<16x512xf32>
    %30 = tpu.matmul %28, %29, %cst_25 {dimension_numbers = #tpu.dot_dimension_numbers<[1], [0], [0], [1], [0, 0, 1, 1], [], []>} : vector<16x512xbf16>, vector<512x512xbf16>, vector<16x512xf32> -> vector<16x512xf32>
    %31 = arith.addf %27, %30 : vector<16x512xf32>
    %c0_26 = arith.constant 0 : index
    %c0_27 = arith.constant 0 : index
    %32 = vector.load %arg11[%c0_26, %c0_27] : memref<1x512xf32, #tpu.memory_space<vmem>>, vector<1x512xf32>
    %33 = vector.broadcast %32 : vector<1x512xf32> to vector<16x512xf32>
    %34 = arith.addf %31, %33 : vector<16x512xf32>
    %cst_28 = arith.constant 0.000000e+00 : f32
    %35 = vector.broadcast %cst_28 : f32 to vector<16x512xf32>
    %36 = arith.maximumf %34, %35 : vector<16x512xf32>
    %37 = arith.truncf %36 : vector<16x512xf32> to vector<16x512xbf16>
    %c0_29 = arith.constant 0 : index
    %c0_30 = arith.constant 0 : index
    %38 = vector.load %arg12[%c0_29, %c0_30] : memref<512x128xbf16, #tpu.memory_space<vmem>>, vector<512x128xbf16>
    %cst_31 = arith.constant dense<0.000000e+00> : vector<16x128xf32>
    %39 = tpu.matmul %37, %38, %cst_31 {dimension_numbers = #tpu.dot_dimension_numbers<[1], [0], [0], [1], [0, 0, 1, 1], [], []>} : vector<16x512xbf16>, vector<512x128xbf16>, vector<16x128xf32> -> vector<16x128xf32>
    %c0_32 = arith.constant 0 : index
    %c0_33 = arith.constant 0 : index
    %40 = vector.load %arg13[%c0_32, %c0_33] : memref<1x128xf32, #tpu.memory_space<vmem>>, vector<1x128xf32>
    %41 = vector.broadcast %40 : vector<1x128xf32> to vector<16x128xf32>
    %42 = arith.addf %39, %41 : vector<16x128xf32>
    %c0_34 = arith.constant 0 : index
    %c0_35 = arith.constant 0 : index
    %43 = vector.load %arg14[%c0_34, %c0_35] : memref<16x128xf32, #tpu.memory_space<vmem>>, vector<16x128xf32>
    tpu.vector_store %arg14[%c0_34, %c0_35], %42 {strides = array<i32>} : memref<16x128xf32, #tpu.memory_space<vmem>>, vector<16x128xf32>,
    return
  }
  func.func @transform_0(%arg0: i32) -> (i32, i32) {
    %c0_i32 = arith.constant 0 : i32
    %c0_i32_0 = arith.constant 0 : i32
    return %arg0, %c0_i32 : i32, i32
  }
  func.func @transform_1(%arg0: i32) -> (i32, i32) {
    %c0_i32 = arith.constant 0 : i32
    %c0_i32_0 = arith.constant 0 : i32
    return %arg0, %c0_i32 : i32, i32
  }
  func.func @transform_2(%arg0: i32) -> (i32, i32) {
    %c0_i32 = arith.constant 0 : i32
    %c0_i32_0 = arith.constant 0 : i32
    %c0_i32_1 = arith.constant 0 : i32
    return %c0_i32, %c0_i32_0 : i32, i32
  }
  func.func @transform_3(%arg0: i32) -> (i32, i32) {
    %c0_i32 = arith.constant 0 : i32
    %c0_i32_0 = arith.constant 0 : i32
    %c0_i32_1 = arith.constant 0 : i32
    return %c0_i32, %c0_i32_0 : i32, i32
  }
  func.func @transform_4(%arg0: i32) -> (i32, i32) {
    %c0_i32 = arith.constant 0 : i32
    %c0_i32_0 = arith.constant 0 : i32
    %c0_i32_1 = arith.constant 0 : i32
    return %c0_i32, %c0_i32_0 : i32, i32
  }
  func.func @transform_5(%arg0: i32) -> (i32, i32) {
    %c0_i32 = arith.constant 0 : i32
    %c0_i32_0 = arith.constant 0 : i32
    %c0_i32_1 = arith.constant 0 : i32
    return %c0_i32, %c0_i32_0 : i32, i32
  }
  func.func @transform_6(%arg0: i32) -> (i32, i32) {
    %c0_i32 = arith.constant 0 : i32
    %c0_i32_0 = arith.constant 0 : i32
    %c0_i32_1 = arith.constant 0 : i32
    return %c0_i32, %c0_i32_0 : i32, i32
  }
  func.func @transform_7(%arg0: i32) -> (i32, i32) {
    %c0_i32 = arith.constant 0 : i32
    %c0_i32_0 = arith.constant 0 : i32
    %c0_i32_1 = arith.constant 0 : i32
    return %c0_i32, %c0_i32_0 : i32, i32
  }
  func.func @transform_8(%arg0: i32) -> (i32, i32) {
    %c0_i32 = arith.constant 0 : i32
    %c0_i32_0 = arith.constant 0 : i32
    %c0_i32_1 = arith.constant 0 : i32
    return %c0_i32, %c0_i32_0 : i32, i32
  }
  func.func @transform_9(%arg0: i32) -> (i32, i32) {
    %c0_i32 = arith.constant 0 : i32
    %c0_i32_0 = arith.constant 0 : i32
    %c0_i32_1 = arith.constant 0 : i32
    return %c0_i32, %c0_i32_0 : i32, i32
  }
  func.func @transform_10(%arg0: i32) -> (i32, i32) {
    %c0_i32 = arith.constant 0 : i32
    %c0_i32_0 = arith.constant 0 : i32
    %c0_i32_1 = arith.constant 0 : i32
    return %c0_i32, %c0_i32_0 : i32, i32
  }
  func.func @transform_11(%arg0: i32) -> (i32, i32) {
    %c0_i32 = arith.constant 0 : i32
    %c0_i32_0 = arith.constant 0 : i32
    %c0_i32_1 = arith.constant 0 : i32
    return %c0_i32, %c0_i32_0 : i32, i32
  }
  func.func @transform_12(%arg0: i32) -> (i32, i32) {
    %c0_i32 = arith.constant 0 : i32
    %c0_i32_0 = arith.constant 0 : i32
    %c0_i32_1 = arith.constant 0 : i32
    return %c0_i32, %c0_i32_0 : i32, i32
  }
  func.func @transform_13(%arg0: i32) -> (i32, i32) {
    %c0_i32 = arith.constant 0 : i32
    %c0_i32_0 = arith.constant 0 : i32
    return %arg0, %c0_i32 : i32, i32
  }
}

</mosaic_0001>

<bundles_post_ra>
// kernel: net_forward.1
= control target key start
LH: loop header
LB: loop body
LE: loop exit
PB: predicated region body
PF: predicated region fallthrough
CT: control target
= control target key end

     0   :  { %18 = vsyncpa [#allocation3], 0  ;;  %s4538_s0 = inlined_call_operand.vmem [shape: bf16[16,512], index: 0, kind: input, shape index: {}]   ;;  %s4539_s1 = inlined_call_operand.vmem [shape: f32[16,16], index: 1, kind: input, shape index: {}]   ;;  %s4540_s2 = inlined_call_operand.vmem [shape: bf16[16,128], index: 2, kind: input, shape index: {}]   ;;  %s4541_s3 = inlined_call_operand.vmem [shape: f32[1,128], index: 3, kind: input, shape index: {}]   ;;  %s4542_s4 = inlined_call_operand.hbm [shape: bf16[128,256], index: 4, kind: input, shape index: {}]   ;;  %s4543_s5 = inlined_call_operand.vmem [shape: f32[1,256], index: 5, kind: input, shape index: {}]   ;;  %s4544_s6 = inlined_call_operand.hbm [shape: bf16[256,512], index: 6, kind: input, shape index: {}]   ;;  %s4545_s7 = inlined_call_operand.vmem [shape: f32[1,512], index: 7, kind: input, shape index: {}]   ;;  %s4546_s8 = inlined_call_operand.hbm [shape: bf16[512,512], index: 8, kind: input, shape index: {}]   ;;  %s4547_s9 = inlined_call_operand.hbm [shape: bf16[512,512], index: 9, kind: input, shape index: {}]   ;;  %s4548_s10 = inlined_call_operand.vmem [shape: f32[1,512], index: 10, kind: input, shape index: {}]   ;;  %s4549_s11 = inlined_call_operand.vmem [shape: bf16[512,128], index: 11, kind: input, shape index: {}]   ;;  %s4550_s12 = inlined_call_operand.vmem [shape: f32[1,128], index: 12, kind: input, shape index: {}]   ;;  %s4551_s13 = inlined_call_operand.vmem [shape: f32[16,128], index: 13, kind: output, shape index: {}]  }
   0x1   :  { %19 = vsyncpa [#allocation5], 0 }
   0x2   :  { %20 = vsyncpa [#allocation8], 0  ;;  %s4227_s25 = smov [#allocation4]   ;;  %s4133_s29 = scalar_lea.hbm %s4544_s6, 8192 }
   0x3   :  { %s48_s26 = sshll.u32 %s4227_s25, 4  ;;  %p4134_p0 = scmp.ne.s32.totalorder %s4544_s6, %s4133_s29  ;;  %s49_s26 = int_to_ptr.vmem [resolvable:$true] %s48_s26 }
   0x4   :  { %p4137_p1 = scmp.lt.u32.totalorder %s4133_s29, %s4544_s6 }
   0x6   :  { %p4139_p2 = pnand %p4137_p1, %p4134_p0 }
   0x8   :  { %4142 = shalt.err (!%p4139_p2)
}
   0x9   :  { %s4143_s17 = scalar_lea.vmem %s49_s26, 8192  ;;  %p4148_p4 = scmp.lt.s32.totalorder %s49_s26, %s49_s26 }
   0xa   :  { %p4144_p3 = scmp.ne.s32.totalorder %s49_s26, %s4143_s17  ;;  %p4149_p5 = scmp.lt.s32.totalorder %s4143_s17, %s4143_s17 }
   0xc   :  { %p4150_p6 = por %p4149_p5, %p4148_p4 }
   0xe   :  { %p4151_p7 = pnand %p4150_p6, %p4144_p3 }
  0x10   :  { %4154 = shalt.err (!%p4151_p7)
}
  0x11   :  { %s4228_s18 = smov 256   ;;  %s4229_s19 = smov 16  }
  0x12   :  { %54 = dma.hbm_to_vmem [thread:$0]  %s4544_s6, 8192, %s49_s26, [#allocation5], %s4228_s18, %s4228_s18, %s4229_s19  }
  0x13   :  { %s4230_s22 = smov [#allocation2]   ;;  %s4155_s27 = scalar_lea.hbm %s4542_s4, 2048 }
  0x14   :  { %s34_s23 = sshll.u32 %s4230_s22, 4  ;;  %p4156_p8 = scmp.ne.s32.totalorder %s4542_s4, %s4155_s27  ;;  %s35_s23 = int_to_ptr.vmem [resolvable:$true] %s34_s23 }
  0x15   :  { %p4159_p9 = scmp.lt.u32.totalorder %s4155_s27, %s4542_s4 }
  0x17   :  { %p4161_p10 = pnand %p4159_p9, %p4156_p8 }
  0x19   :  { %4164 = shalt.err (!%p4161_p10)
}
  0x1a   :  { %s4165_s15 = scalar_lea.vmem %s35_s23, 2048  ;;  %p4170_p12 = scmp.lt.s32.totalorder %s35_s23, %s35_s23 }
  0x1b   :  { %p4166_p11 = scmp.ne.s32.totalorder %s35_s23, %s4165_s15  ;;  %p4171_p13 = scmp.lt.s32.totalorder %s4165_s15, %s4165_s15 }
  0x1d   :  { %p4172_p0 = por %p4171_p13, %p4170_p12 }
  0x1f   :  { %p4173_p1 = pnand %p4172_p0, %p4166_p11 }
  0x21   :  { %4176 = shalt.err (!%p4173_p1)
}
  0x22   :  { %s4231_s6 = smov 128   ;;  %s4232_s26 = smov 8  }
  0x23   :  { %40 = dma.hbm_to_vmem [thread:$0]  %s4542_s4, 2048, %s35_s23, [#allocation3], %s4231_s6, %s4231_s6, %s4232_s26  }
  0x24   :  { %s4233_s20 = smov [#allocation6]   ;;  %s4234_s22 = smov [#allocation7]  }
  0x25   :  { %s62_s21 = sshll.u32 %s4233_s20, 4  ;;  %s74_s24 = sshll.u32 %s4234_s22, 4  ;;  %s63_s21 = int_to_ptr.vmem [resolvable:$true] %s62_s21  ;;  %s4335_s24 = int_to_ptr.vmem [resolvable:$true] %s74_s24 }
  0x26   :  { %s4177_s28 = scalar_lea.hbm %s4546_s8, 16384 }
  0x27   :  { %p4178_p2 = scmp.ne.s32.totalorder %s4546_s8, %s4177_s28  ;;  %p4181_p3 = scmp.lt.u32.totalorder %s4177_s28, %s4546_s8 }
  0x29   :  { %p4183_p4 = pnand %p4181_p3, %p4178_p2 }
  0x2b   :  { %4186 = shalt.err (!%p4183_p4)
}
  0x2c   :  { %s4187_s4 = scalar_lea.vmem %s63_s21, 16384  ;;  %p4192_p6 = scmp.lt.s32.totalorder %s63_s21, %s63_s21 }
  0x2d   :  { %p4188_p5 = scmp.ne.s32.totalorder %s63_s21, %s4187_s4  ;;  %p4193_p7 = scmp.lt.s32.totalorder %s4187_s4, %s4187_s4 }
  0x2f   :  { %p4194_p8 = por %p4193_p7, %p4192_p6 }
  0x31   :  { %p4195_p9 = pnand %p4194_p8, %p4188_p5 }
  0x33   :  { %4198 = shalt.err (!%p4195_p9)
}
  0x34   :  { %68 = dma.hbm_to_vmem [thread:$0]  %s4546_s8, 16384, %s63_s21, [#allocation5], %s4228_s18, %s4228_s18, %s4229_s19  }
  0x35   :  { %s4199_s17 = scalar_lea.hbm %s4547_s9, 16384 }
  0x36   :  { %p4200_p10 = scmp.ne.s32.totalorder %s4547_s9, %s4199_s17  ;;  %p4203_p11 = scmp.lt.u32.totalorder %s4199_s17, %s4547_s9 }
  0x38   :  { %p4205_p12 = pnand %p4203_p11, %p4200_p10 }
  0x3a   :  { %4208 = shalt.err (!%p4205_p12)
}
  0x3b   :  { %s4209_s28 = scalar_lea.vmem %s4335_s24, 16384  ;;  %p4214_p0 = scmp.lt.s32.totalorder %s4335_s24, %s4335_s24 }
  0x3c   :  { %p4210_p13 = scmp.ne.s32.totalorder %s4335_s24, %s4209_s28  ;;  %p4215_p1 = scmp.lt.s32.totalorder %s4209_s28, %s4209_s28 }
  0x3e   :  { %p4216_p2 = por %p4215_p1, %p4214_p0 }
  0x40   :  { %p4217_p3 = pnand %p4216_p2, %p4210_p13 }
  0x42   :  { %4220 = shalt.err (!%p4217_p3)
}
  0x43   :  { %80 = dma.hbm_to_vmem [thread:$0]  %s4547_s9, 16384, %s4335_s24, [#allocation8], %s4228_s18, %s4228_s18, %s4229_s19  }
  0x44   :  { %4221 = dma.done.wait [#allocation3], 2048  }
  0x45   :  { %4222 = vsyncadd [#allocation3], 4294965248 }
  0x46   :  { %4223 = dma.done.wait [#allocation5], 24576  }
  0x47   :  { %4224 = vsyncadd [#allocation5], 4294942720 }
  0x48   :  { %4225 = dma.done.wait [#allocation8], 16384  }
  0x49   :  { %4226 = vsyncadd [#allocation8], 4294950912  ;;  %v4235_v0 = vmov 0.0   ;;  %vm4236_vm0 = vmmov 0   ;;  %v3590_v1 = vld [vmem:[%s4540_s2] sm:$0xff]   ;;  %v101_v3 = vld [vmem:[%s4539_s1 + $0x8] sm:$0xff] }
  0x4a   :  { %3549 = vmatprep.subr.bf16.mxu0 %v4235_v0  ;;  %3551 = vmatprep.mubr.msk.bf16.mxu0 %vm4236_vm0, %v4235_v0  ;;  %v100_v2 = vld [vmem:[%s4539_s1] sm:$0xff]  ;;  %vm118_vm1 = vcmask 130048   ;;  %v3594_v7 = vld [vmem:[#allocation2 + $0x14] ss:$8 sps:$4 sm:$0xff]   ;;  %v3596_v8 = vld [vmem:[#allocation2 + $0x10] ss:$8 sps:$4 sm:$0xff]  }
  0x4b   :  { %3550 = vmatpush3.bf16.msra.mxu0 %v3590_v1  ;;  %v102_v4 = vpack.c.bf16 %v101_v3, %v100_v2  ;;  %v3591_v5 = vld [vmem:[#allocation2 + $0x4] ss:$8 sps:$4 sm:$0xff]   ;;  %v3593_v6 = vld [vmem:[#allocation2] ss:$8 sps:$4 sm:$0xff]   ;;  %v3600_v11 = vld [vmem:[#allocation2 + $0x34] ss:$8 sps:$4 sm:$0xff]  }
  0x4c   :  { %274 = vmatprep.subr.bf16.mxu1 %v3591_v5  ;;  %v3597_v9 = vld [vmem:[#allocation2 + $0x24] ss:$8 sps:$4 sm:$0xff]   ;;  %v3599_v10 = vld [vmem:[#allocation2 + $0x20] ss:$8 sps:$4 sm:$0xff]   ;;  %v3602_v12 = vld [vmem:[#allocation2 + $0x30] ss:$8 sps:$4 sm:$0xff]  }
  0x4d   :  { %275 = vmatpush1.bf16.msra.mxu1 %v3593_v6  ;;  %v3603_v13 = vld [vmem:[#allocation2 + $0x44] ss:$8 sps:$4 sm:$0xff]   ;;  %v3605_v14 = vld [vmem:[#allocation2 + $0x40] ss:$8 sps:$4 sm:$0xff]   ;;  %v3606_v15 = vld [vmem:[#allocation2 + $0x54] ss:$8 sps:$4 sm:$0xff]  }
  0x4e   :  { %3552 = vmatmul.mubr.msk.bf16.vlgmr.msra.gmra.mrb[0].mxu0 %vm118_vm1, %v102_v4  ;;  %276 = vmatprep.subr.bf16.mxu1 %v3594_v7  ;;  %v3608_v16 = vld [vmem:[#allocation2 + $0x50] ss:$8 sps:$4 sm:$0xff]   ;;  %v3609_v17 = vld [vmem:[#allocation2 + $0x64] ss:$8 sps:$4 sm:$0xff]   ;;  %v3611_v18 = vld [vmem:[#allocation2 + $0x60] ss:$8 sps:$4 sm:$0xff]  }
  0x4f   :  { %v3612_v19 = vld [vmem:[#allocation2 + $0x74] ss:$8 sps:$4 sm:$0xff]   ;;  %v3614_v20 = vld [vmem:[#allocation2 + $0x70] ss:$8 sps:$4 sm:$0xff]   ;;  %v4237_v21 = vmov 0  }
  0x50   :  { %306 = vmatprep.mubr.bf16.mxu1 %v4237_v21  ;;  %v3615_v22 = vld [vmem:[#allocation4] ss:$16 sps:$4 sm:$0xff]   ;;  %v3617_v23 = vld [vmem:[#allocation4 + $0x4] ss:$16 sps:$4 sm:$0xff]   ;;  %v3620_v24 = vld [vmem:[#allocation4 + $0xc] ss:$16 sps:$4 sm:$0xff]  }
  0x51   :  { %277 = vmatpush1.bf16.msra.mxu1 %v3596_v8  ;;  %v3623_v25 = vld [vmem:[#allocation4 + $0x24] ss:$16 sps:$4 sm:$0xff]   ;;  %729 = vmatprep.subr.bf16.mxu0 %v3617_v23  ;;  %v3621_v26 = vld [vmem:[#allocation4 + $0x20] ss:$16 sps:$4 sm:$0xff]   ;;  %v3618_v60 = vld [vmem:[#allocation4 + $0x8] ss:$16 sps:$4 sm:$0xff]  }
  0x52   :  { %278 = vmatprep.subr.bf16.mxu1 %v3597_v9  ;;  %730 = vmatpush1.bf16.msra.mxu0 %v3615_v22  ;;  %v3629_v27 = vld [vmem:[#allocation4 + $0x44] ss:$16 sps:$4 sm:$0xff]   ;;  %v3627_v28 = vld [vmem:[#allocation4 + $0x40] ss:$16 sps:$4 sm:$0xff]   ;;  %v3626_v62 = vld [vmem:[#allocation4 + $0x2c] ss:$16 sps:$4 sm:$0xff]  }
  0x53   :  { %731 = vmatprep.subr.bf16.mxu0 %v3623_v25  ;;  %v3635_v29 = vld [vmem:[#allocation4 + $0x64] ss:$16 sps:$4 sm:$0xff]   ;;  %v3633_v30 = vld [vmem:[#allocation4 + $0x60] ss:$16 sps:$4 sm:$0xff]   ;;  %v3624_v63 = vld [vmem:[#allocation4 + $0x28] ss:$16 sps:$4 sm:$0xff]  }
  0x54   :  { %v3641_v31 = vld [vmem:[#allocation4 + $0x84] ss:$16 sps:$4 sm:$0xff]   ;;  %v3639_v32 = vld [vmem:[#allocation4 + $0x80] ss:$16 sps:$4 sm:$0xff]   ;;  %v3632_v0 = vld [vmem:[#allocation4 + $0x4c] ss:$16 sps:$4 sm:$0xff]  }
  0x55   :  { %279 = vmatpush1.bf16.msra.mxu1 %v3599_v10  ;;  %v3647_v33 = vld [vmem:[#allocation4 + $0xa4] ss:$16 sps:$4 sm:$0xff]   ;;  %v3645_v34 = vld [vmem:[#allocation4 + $0xa0] ss:$16 sps:$4 sm:$0xff]   ;;  %v3630_v1 = vld [vmem:[#allocation4 + $0x48] ss:$16 sps:$4 sm:$0xff]  }
  0x56   :  { %280 = vmatprep.subr.bf16.mxu1 %v3600_v11  ;;  %732 = vmatpush1.bf16.msra.mxu0 %v3621_v26  ;;  %v3653_v35 = vld [vmem:[#allocation4 + $0xc4] ss:$16 sps:$4 sm:$0xff]   ;;  %v3651_v36 = vld [vmem:[#allocation4 + $0xc0] ss:$16 sps:$4 sm:$0xff]   ;;  %v3638_v2 = vld [vmem:[#allocation4 + $0x6c] ss:$16 sps:$4 sm:$0xff]  }
  0x57   :  { %733 = vmatprep.subr.bf16.mxu0 %v3629_v27  ;;  %v3659_v37 = vld [vmem:[#allocation4 + $0xe4] ss:$16 sps:$4 sm:$0xff]   ;;  %v3657_v38 = vld [vmem:[#allocation4 + $0xe0] ss:$16 sps:$4 sm:$0xff]   ;;  %v3636_v3 = vld [vmem:[#allocation4 + $0x68] ss:$16 sps:$4 sm:$0xff]  }
  0x58   :  { %v3665_v39 = vld [vmem:[#allocation4 + $0x104] ss:$16 sps:$4 sm:$0xff]   ;;  %v3663_v40 = vld [vmem:[#allocation4 + $0x100] ss:$16 sps:$4 sm:$0xff]   ;;  %v3644_v4 = vld [vmem:[#allocation4 + $0x8c] ss:$16 sps:$4 sm:$0xff]  }
  0x59   :  { %281 = vmatpush1.bf16.msra.mxu1 %v3602_v12  ;;  %v3671_v41 = vld [vmem:[#allocation4 + $0x124] ss:$16 sps:$4 sm:$0xff]   ;;  %v3669_v42 = vld [vmem:[#allocation4 + $0x120] ss:$16 sps:$4 sm:$0xff]   ;;  %v3642_v5 = vld [vmem:[#allocation4 + $0x88] ss:$16 sps:$4 sm:$0xff]  }
  0x5a   :  { %282 = vmatprep.subr.bf16.mxu1 %v3603_v13  ;;  %734 = vmatpush1.bf16.msra.mxu0 %v3627_v28  ;;  %v3677_v43 = vld [vmem:[#allocation4 + $0x144] ss:$16 sps:$4 sm:$0xff]   ;;  %v3675_v44 = vld [vmem:[#allocation4 + $0x140] ss:$16 sps:$4 sm:$0xff]   ;;  %v3650_v6 = vld [vmem:[#allocation4 + $0xac] ss:$16 sps:$4 sm:$0xff]  }
  0x5b   :  { %735 = vmatprep.subr.bf16.mxu0 %v3635_v29  ;;  %v3683_v45 = vld [vmem:[#allocation4 + $0x164] ss:$16 sps:$4 sm:$0xff]   ;;  %v3681_v46 = vld [vmem:[#allocation4 + $0x160] ss:$16 sps:$4 sm:$0xff]   ;;  %v3648_v7 = vld [vmem:[#allocation4 + $0xa8] ss:$16 sps:$4 sm:$0xff]  }
  0x5c   :  { %v3689_v47 = vld [vmem:[#allocation4 + $0x184] ss:$16 sps:$4 sm:$0xff]   ;;  %v3687_v48 = vld [vmem:[#allocation4 + $0x180] ss:$16 sps:$4 sm:$0xff]   ;;  %v3656_v8 = vld [vmem:[#allocation4 + $0xcc] ss:$16 sps:$4 sm:$0xff]  }
  0x5d   :  { %283 = vmatpush1.bf16.msra.mxu1 %v3605_v14  ;;  %v3695_v49 = vld [vmem:[#allocation4 + $0x1a4] ss:$16 sps:$4 sm:$0xff]   ;;  %v3693_v50 = vld [vmem:[#allocation4 + $0x1a0] ss:$16 sps:$4 sm:$0xff]   ;;  %v3654_v9 = vld [vmem:[#allocation4 + $0xc8] ss:$16 sps:$4 sm:$0xff]  }
  0x5e   :  { %284 = vmatprep.subr.bf16.mxu1 %v3606_v15  ;;  %736 = vmatpush1.bf16.msra.mxu0 %v3633_v30  ;;  %v3127_v51 = vld [vmem:[%s4541_s3] ss:$0 sm:$0xff]  ;;  %v3662_v10 = vld [vmem:[#allocation4 + $0xec] ss:$16 sps:$4 sm:$0xff]   ;;  %v3660_v11 = vld [vmem:[#allocation4 + $0xe8] ss:$16 sps:$4 sm:$0xff]  }
  0x5f   :  { %737 = vmatprep.subr.bf16.mxu0 %v3641_v31  ;;  %v3668_v12 = vld [vmem:[#allocation4 + $0x10c] ss:$16 sps:$4 sm:$0xff]   ;;  %v3666_v13 = vld [vmem:[#allocation4 + $0x108] ss:$16 sps:$4 sm:$0xff]   ;;  %v3699_v26 = vld [vmem:[#allocation4 + $0x1c0] ss:$16 sps:$4 sm:$0xff]  }
  0x60   :  { %v3674_v14 = vld [vmem:[#allocation4 + $0x12c] ss:$16 sps:$4 sm:$0xff]   ;;  %v3672_v15 = vld [vmem:[#allocation4 + $0x128] ss:$16 sps:$4 sm:$0xff]   ;;  %v3707_v28 = vld [vmem:[#allocation4 + $0x1e4] ss:$16 sps:$4 sm:$0xff]  }
  0x61   :  { %285 = vmatpush1.bf16.msra.mxu1 %v3608_v16  ;;  %v3680_v16 = vld [vmem:[#allocation4 + $0x14c] ss:$16 sps:$4 sm:$0xff]   ;;  %v3690_v21 = vld [vmem:[#allocation4 + $0x188] ss:$16 sps:$4 sm:$0xff]   ;;  %v3705_v30 = vld [vmem:[#allocation4 + $0x1e0] ss:$16 sps:$4 sm:$0xff]  }
  0x62   :  { %286 = vmatprep.subr.bf16.mxu1 %v3609_v17  ;;  %738 = vmatpush1.bf16.msra.mxu0 %v3639_v32  ;;  %v3678_v17 = vld [vmem:[#allocation4 + $0x148] ss:$16 sps:$4 sm:$0xff]   ;;  %v3698_v22 = vld [vmem:[#allocation4 + $0x1ac] ss:$16 sps:$4 sm:$0xff]   ;;  %v3713_v32 = vld [vmem:[#allocation7 + $0x4] ss:$16 sps:$4 sm:$0xff]  }
  0x63   :  { %739 = vmatprep.subr.bf16.mxu0 %v3647_v33  ;;  %v3696_v23 = vld [vmem:[#allocation4 + $0x1a8] ss:$16 sps:$4 sm:$0xff]   ;;  %v3704_v25 = vld [vmem:[#allocation4 + $0x1cc] ss:$16 sps:$4 sm:$0xff]  }
  0x64   :  { %v3702_v27 = vld [vmem:[#allocation4 + $0x1c8] ss:$16 sps:$4 sm:$0xff]   ;;  %v3710_v29 = vld [vmem:[#allocation4 + $0x1ec] ss:$16 sps:$4 sm:$0xff]  }
  0x65   :  { %287 = vmatpush1.bf16.msra.mxu1 %v3611_v18  ;;  %v3686_v18 = vld [vmem:[#allocation4 + $0x16c] ss:$16 sps:$4 sm:$0xff]   ;;  %v3708_v31 = vld [vmem:[#allocation4 + $0x1e8] ss:$16 sps:$4 sm:$0xff]  }
  0x66   :  { %288 = vmatprep.subr.bf16.mxu1 %v3612_v19  ;;  %740 = vmatpush1.bf16.msra.mxu0 %v3645_v34  ;;  %v3684_v19 = vld [vmem:[#allocation4 + $0x168] ss:$16 sps:$4 sm:$0xff]   ;;  %v3716_v33 = vld [vmem:[#allocation7 + $0xc] ss:$16 sps:$4 sm:$0xff]   ;;  %v184_v34 = vlaneseq }
  0x67   :  { %741 = vmatprep.subr.bf16.mxu0 %v3653_v35 }
  0x68   :  { %v4384_v35 = vshrl.u32 %v184_v34, 7  ;;  %v3782_v34 = vld [vmem:[#allocation7 + $0x16c] ss:$16 sps:$4 sm:$0xff]  }
  0x69   :  { %289 = vmatpush1.bf16.msra.mxu1 %v3614_v20  ;;  %v3692_v20 = vld [vmem:[#allocation4 + $0x18c] ss:$16 sps:$4 sm:$0xff]  }
  0x6a   :  { %772 = vmatprep.subr.bf16.mxu1 %v3620_v24  ;;  %742 = vmatpush1.bf16.msra.mxu0 %v3651_v36  ;;  %v3701_v24 = vld [vmem:[#allocation4 + $0x1c4] ss:$16 sps:$4 sm:$0xff]   ;;  %v4387_v36 = vsub.s32 0, %v4384_v35 }
  0x6b   :  { %743 = vmatprep.subr.bf16.mxu0 %v3659_v37  ;;  %v182_v37 = vld [vmem:[%s4543_s5] sm:$0x3] }
  0x6e   :  { %744 = vmatpush1.bf16.msra.mxu0 %v3657_v38  ;;  %v4393_v38 = vsub.s32 1, %v4384_v35 }
  0x6f   :  { %745 = vmatprep.subr.bf16.mxu0 %v3665_v39  ;;  %v187_v39 = vrot.slane %v182_v37, %v4387_v36 }
  0x72   :  { %746 = vmatpush1.bf16.msra.mxu0 %v3663_v40  ;;  %v191_v40 = vrot.slane %v182_v37, %v4393_v38  ;;  %v3777_v37 = vld [vmem:[#allocation7 + $0x160] ss:$16 sps:$4 sm:$0xff]  }
  0x73   :  { %747 = vmatprep.subr.bf16.mxu0 %v3671_v41 }
  0x76   :  { %748 = vmatpush1.bf16.msra.mxu0 %v3669_v42 }
  0x77   :  { %749 = vmatprep.subr.bf16.mxu0 %v3677_v43 }
  0x7a   :  { %750 = vmatpush1.bf16.msra.mxu0 %v3675_v44 }
  0x7b   :  { %751 = vmatprep.subr.bf16.mxu0 %v3683_v45 }
  0x7e   :  { %752 = vmatpush1.bf16.msra.mxu0 %v3681_v46 }
  0x7f   :  { %753 = vmatprep.subr.bf16.mxu0 %v3689_v47 }
  0x82   :  { %754 = vmatpush1.bf16.msra.mxu0 %v3687_v48 }
  0x83   :  { %755 = vmatprep.subr.bf16.mxu0 %v3695_v49 }
  0x86   :  { %756 = vmatpush1.bf16.msra.mxu0 %v3693_v50 }
  0x87   :  { %757 = vmatprep.subr.bf16.mxu0 %v3701_v24  ;;  %v3762_v24 = vld [vmem:[#allocation7 + $0x108] ss:$16 sps:$4 sm:$0xff]  }
  0x8a   :  { %758 = vmatpush1.bf16.msra.mxu0 %v3699_v26  ;;  %v3770_v26 = vld [vmem:[#allocation7 + $0x12c] ss:$16 sps:$4 sm:$0xff]  }
  0x8b   :  { %759 = vmatprep.subr.bf16.mxu0 %v3707_v28  ;;  %v3768_v28 = vld [vmem:[#allocation7 + $0x128] ss:$16 sps:$4 sm:$0xff]  }
  0x8e   :  { %760 = vmatpush1.bf16.msra.mxu0 %v3705_v30  ;;  %v3776_v30 = vld [vmem:[#allocation7 + $0x14c] ss:$16 sps:$4 sm:$0xff]  }
  0x8f   :  { %1727 = vmatprep.subr.bf16.mxu0 %v3713_v32  ;;  %v3774_v32 = vld [vmem:[#allocation7 + $0x148] ss:$16 sps:$4 sm:$0xff]  }
 0x121   :  { %v156_v52 = vpop.f32.mrb[0].mxu0 }
 0x122   :  { %v157_v53 = vadd.f32 %v3127_v51, %v156_v52  ;;  %v3553_v54 = vpop.f32.mrb[1].mxu0 }
 0x123   :  { %v159_v55 = vpop.f32.mrb[2].mxu0 }
 0x124   :  { %v160_v56 = vadd.f32 %v3127_v51, %v159_v55  ;;  %v3554_v57 = vpop.f32.mrb[3].mxu0  ;;  %v163_v58 = vmax.f32 %v157_v53, 0.0  ;;  %v3711_v55 = vld [vmem:[#allocation7] ss:$16 sps:$4 sm:$0xff]  }
 0x125   :  { %v3719_v57 = vld [vmem:[#allocation7 + $0x24] ss:$16 sps:$4 sm:$0xff]  }
 0x126   :  { %v164_v59 = vmax.f32 %v160_v56, 0.0  ;;  %v3714_v56 = vld [vmem:[#allocation7 + $0x8] ss:$16 sps:$4 sm:$0xff]  }
 0x128   :  { %v165_v61 = vpack.c.bf16 %v164_v59, %v163_v58  ;;  %v3722_v58 = vld [vmem:[#allocation7 + $0x2c] ss:$16 sps:$4 sm:$0xff]   ;;  %v3717_v59 = vld [vmem:[#allocation7 + $0x20] ss:$16 sps:$4 sm:$0xff]  }
 0x12a   :  { %307 = vmatmul.mubr.bf16.vlgmr.msra.gmra.mrb[0].mxu1 %v165_v61  ;;  %v3725_v61 = vld [vmem:[#allocation7 + $0x44] ss:$16 sps:$4 sm:$0xff]  }
 0x12b   :  { %773 = vmatpush1.bf16.msra.mxu1 %v3618_v60  ;;  %v3720_v60 = vld [vmem:[#allocation7 + $0x28] ss:$16 sps:$4 sm:$0xff]  }
 0x12c   :  { %774 = vmatprep.subr.bf16.mxu1 %v3626_v62  ;;  %v3728_v62 = vld [vmem:[#allocation7 + $0x4c] ss:$16 sps:$4 sm:$0xff]  }
 0x12f   :  { %775 = vmatpush1.bf16.msra.mxu1 %v3624_v63  ;;  %v3723_v63 = vld [vmem:[#allocation7 + $0x40] ss:$16 sps:$4 sm:$0xff]  }
 0x130   :  { %776 = vmatprep.subr.bf16.mxu1 %v3632_v0  ;;  %v3726_v0 = vld [vmem:[#allocation7 + $0x48] ss:$16 sps:$4 sm:$0xff]  }
 0x133   :  { %777 = vmatpush1.bf16.msra.mxu1 %v3630_v1  ;;  %v3731_v1 = vld [vmem:[#allocation7 + $0x64] ss:$16 sps:$4 sm:$0xff]  }
 0x134   :  { %778 = vmatprep.subr.bf16.mxu1 %v3638_v2  ;;  %v3734_v2 = vld [vmem:[#allocation7 + $0x6c] ss:$16 sps:$4 sm:$0xff]  }
 0x137   :  { %779 = vmatpush1.bf16.msra.mxu1 %v3636_v3  ;;  %v3729_v3 = vld [vmem:[#allocation7 + $0x60] ss:$16 sps:$4 sm:$0xff]  }
 0x138   :  { %780 = vmatprep.subr.bf16.mxu1 %v3644_v4  ;;  %v3732_v4 = vld [vmem:[#allocation7 + $0x68] ss:$16 sps:$4 sm:$0xff]  }
 0x13b   :  { %781 = vmatpush1.bf16.msra.mxu1 %v3642_v5  ;;  %v3737_v5 = vld [vmem:[#allocation7 + $0x84] ss:$16 sps:$4 sm:$0xff]  }
 0x13c   :  { %782 = vmatprep.subr.bf16.mxu1 %v3650_v6  ;;  %v3740_v6 = vld [vmem:[#allocation7 + $0x8c] ss:$16 sps:$4 sm:$0xff]  }
 0x13f   :  { %783 = vmatpush1.bf16.msra.mxu1 %v3648_v7  ;;  %v3735_v7 = vld [vmem:[#allocation7 + $0x80] ss:$16 sps:$4 sm:$0xff]  }
 0x140   :  { %784 = vmatprep.subr.bf16.mxu1 %v3656_v8  ;;  %v3738_v8 = vld [vmem:[#allocation7 + $0x88] ss:$16 sps:$4 sm:$0xff]  }
 0x143   :  { %785 = vmatpush1.bf16.msra.mxu1 %v3654_v9  ;;  %v3743_v9 = vld [vmem:[#allocation7 + $0xa4] ss:$16 sps:$4 sm:$0xff]  }
 0x144   :  { %786 = vmatprep.subr.bf16.mxu1 %v3662_v10  ;;  %v3746_v10 = vld [vmem:[#allocation7 + $0xac] ss:$16 sps:$4 sm:$0xff]  }
 0x147   :  { %787 = vmatpush1.bf16.msra.mxu1 %v3660_v11  ;;  %v3741_v11 = vld [vmem:[#allocation7 + $0xa0] ss:$16 sps:$4 sm:$0xff]  }
 0x148   :  { %788 = vmatprep.subr.bf16.mxu1 %v3668_v12  ;;  %v3744_v12 = vld [vmem:[#allocation7 + $0xa8] ss:$16 sps:$4 sm:$0xff]  }
 0x14b   :  { %789 = vmatpush1.bf16.msra.mxu1 %v3666_v13  ;;  %v3749_v13 = vld [vmem:[#allocation7 + $0xc4] ss:$16 sps:$4 sm:$0xff]  }
 0x14c   :  { %790 = vmatprep.subr.bf16.mxu1 %v3674_v14  ;;  %v3752_v14 = vld [vmem:[#allocation7 + $0xcc] ss:$16 sps:$4 sm:$0xff]  }
 0x14f   :  { %791 = vmatpush1.bf16.msra.mxu1 %v3672_v15  ;;  %v3747_v15 = vld [vmem:[#allocation7 + $0xc0] ss:$16 sps:$4 sm:$0xff]  }
 0x150   :  { %792 = vmatprep.subr.bf16.mxu1 %v3680_v16  ;;  %v3750_v16 = vld [vmem:[#allocation7 + $0xc8] ss:$16 sps:$4 sm:$0xff]  }
 0x153   :  { %793 = vmatpush1.bf16.msra.mxu1 %v3678_v17  ;;  %v3755_v17 = vld [vmem:[#allocation7 + $0xe4] ss:$16 sps:$4 sm:$0xff]  }
 0x154   :  { %794 = vmatprep.subr.bf16.mxu1 %v3686_v18  ;;  %v3758_v18 = vld [vmem:[#allocation7 + $0xec] ss:$16 sps:$4 sm:$0xff]  }
 0x157   :  { %795 = vmatpush1.bf16.msra.mxu1 %v3684_v19  ;;  %v3753_v19 = vld [vmem:[#allocation7 + $0xe0] ss:$16 sps:$4 sm:$0xff]  }
 0x158   :  { %796 = vmatprep.subr.bf16.mxu1 %v3692_v20  ;;  %v3756_v20 = vld [vmem:[#allocation7 + $0xe8] ss:$16 sps:$4 sm:$0xff]  }
 0x15b   :  { %797 = vmatpush1.bf16.msra.mxu1 %v3690_v21  ;;  %v3761_v21 = vld [vmem:[#allocation7 + $0x104] ss:$16 sps:$4 sm:$0xff]  }
 0x15c   :  { %798 = vmatprep.subr.bf16.mxu1 %v3698_v22  ;;  %v3764_v22 = vld [vmem:[#allocation7 + $0x10c] ss:$16 sps:$4 sm:$0xff]  }
 0x15f   :  { %799 = vmatpush1.bf16.msra.mxu1 %v3696_v23  ;;  %v3759_v23 = vld [vmem:[#allocation7 + $0x100] ss:$16 sps:$4 sm:$0xff]  }
 0x160   :  { %800 = vmatprep.subr.bf16.mxu1 %v3704_v25  ;;  %v3767_v25 = vld [vmem:[#allocation7 + $0x124] ss:$16 sps:$4 sm:$0xff]  }
 0x163   :  { %801 = vmatpush1.bf16.msra.mxu1 %v3702_v27  ;;  %v3765_v27 = vld [vmem:[#allocation7 + $0x120] ss:$16 sps:$4 sm:$0xff]  }
 0x164   :  { %802 = vmatprep.subr.bf16.mxu1 %v3710_v29  ;;  %v3773_v29 = vld [vmem:[#allocation7 + $0x144] ss:$16 sps:$4 sm:$0xff]  }
 0x167   :  { %803 = vmatpush1.bf16.msra.mxu1 %v3708_v31  ;;  %v3771_v31 = vld [vmem:[#allocation7 + $0x140] ss:$16 sps:$4 sm:$0xff]  }
 0x168   :  { %1813 = vmatprep.subr.bf16.mxu1 %v3716_v33  ;;  %v3779_v33 = vld [vmem:[#allocation7 + $0x164] ss:$16 sps:$4 sm:$0xff]  }
 0x1fd   :  { %v308_v41 = vpop.f32.mrb[0].mxu1 }
 0x1fe   :  { %v309_v42 = vadd.f32 %v308_v41, %v187_v39  ;;  %v310_v43 = vpop.f32.mrb[1].mxu1  ;;  %v3788_v41 = vld [vmem:[#allocation7 + $0x18c] ss:$16 sps:$4 sm:$0xff]  }
 0x1ff   :  { %v311_v44 = vadd.f32 %v310_v43, %v191_v40  ;;  %v312_v45 = vpop.f32.mrb[2].mxu1  ;;  %v3786_v43 = vld [vmem:[#allocation7 + $0x188] ss:$16 sps:$4 sm:$0xff]  }
 0x200   :  { %v313_v46 = vadd.f32 %v312_v45, %v187_v39  ;;  %v314_v47 = vpop.f32.mrb[3].mxu1  ;;  %v317_v49 = vmax.f32 %v309_v42, 0.0  ;;  %v3780_v39 = vld [vmem:[#allocation7 + $0x168] ss:$16 sps:$4 sm:$0xff]   ;;  %v3783_v42 = vld [vmem:[#allocation7 + $0x180] ss:$16 sps:$4 sm:$0xff]  }
 0x201   :  { %v315_v48 = vadd.f32 %v314_v47, %v191_v40  ;;  %v318_v51 = vmax.f32 %v311_v44, 0.0  ;;  %v3785_v40 = vld [vmem:[#allocation7 + $0x184] ss:$16 sps:$4 sm:$0xff]   ;;  %v3794_v45 = vld [vmem:[#allocation7 + $0x1ac] ss:$16 sps:$4 sm:$0xff]  }
 0x202   :  { %v319_v50 = vmax.f32 %v313_v46, 0.0  ;;  %v3791_v44 = vld [vmem:[#allocation7 + $0x1a4] ss:$16 sps:$4 sm:$0xff]   ;;  %v3789_v46 = vld [vmem:[#allocation7 + $0x1a0] ss:$16 sps:$4 sm:$0xff]  }
 0x203   :  { %v320_v52 = vmax.f32 %v315_v48, 0.0  ;;  %v3792_v47 = vld [vmem:[#allocation7 + $0x1a8] ss:$16 sps:$4 sm:$0xff]   ;;  %v3797_v48 = vld [vmem:[#allocation7 + $0x1c4] ss:$16 sps:$4 sm:$0xff]  }
 0x204   :  { %v321_v53 = vpack.c.bf16 %v319_v50, %v317_v49  ;;  %v3800_v49 = vld [vmem:[#allocation7 + $0x1cc] ss:$16 sps:$4 sm:$0xff]   ;;  %v3795_v50 = vld [vmem:[#allocation7 + $0x1c0] ss:$16 sps:$4 sm:$0xff]  }
 0x205   :  { %v322_v54 = vpack.c.bf16 %v320_v52, %v318_v51  ;;  %v3798_v51 = vld [vmem:[#allocation7 + $0x1c8] ss:$16 sps:$4 sm:$0xff]   ;;  %v3803_v52 = vld [vmem:[#allocation7 + $0x1e4] ss:$16 sps:$4 sm:$0xff]  }
 0x207   :  { %761 = vmatprep.mubr.bf16.mxu0 %v322_v54  ;;  %804 = vmatprep.mubr.bf16.mxu1 %v322_v54  ;;  %v3801_v54 = vld [vmem:[#allocation7 + $0x1e0] ss:$16 sps:$4 sm:$0xff]  }
 0x208   :  { %762 = vmatmul.mubr.bf16.vlgmr.msra.gmra.mrb[4].mxu0 %v321_v53  ;;  %805 = vmatmul.mubr.bf16.vlgmr.msra.gmra.mrb[4].mxu1 %v321_v53  ;;  %v3806_v53 = vld [vmem:[#allocation7 + $0x1ec] ss:$16 sps:$4 sm:$0xff]  }
 0x209   :  { %1728 = vmatpush1.bf16.msra.mxu0 %v3711_v55  ;;  %1814 = vmatpush1.bf16.msra.mxu1 %v3714_v56  ;;  %v3804_v55 = vld [vmem:[#allocation7 + $0x1e8] ss:$16 sps:$4 sm:$0xff]   ;;  %v3809_v56 = vld [vmem:[#allocation7 + $0x204] ss:$16 sps:$4 sm:$0xff]  }
 0x20a   :  { %1729 = vmatprep.subr.bf16.mxu0 %v3719_v57  ;;  %1815 = vmatprep.subr.bf16.mxu1 %v3722_v58  ;;  %v3812_v57 = vld [vmem:[#allocation7 + $0x20c] ss:$16 sps:$4 sm:$0xff]   ;;  %v399_v58 = vsub.s32 2, %v4384_v35 }
 0x20d   :  { %1730 = vmatpush1.bf16.msra.mxu0 %v3717_v59  ;;  %1816 = vmatpush1.bf16.msra.mxu1 %v3720_v60  ;;  %v387_v59 = vld [vmem:[%s4545_s7] sm:$0xf]  ;;  %v403_v60 = vsub.s32 3, %v4384_v35 }
 0x20e   :  { %1731 = vmatprep.subr.bf16.mxu0 %v3725_v61  ;;  %1817 = vmatprep.subr.bf16.mxu1 %v3728_v62  ;;  %v392_v61 = vrot.slane %v387_v59, %v4387_v36  ;;  %v400_v62 = vrot.slane %v387_v59, %v399_v58 }
 0x211   :  { %1732 = vmatpush1.bf16.msra.mxu0 %v3723_v63  ;;  %1818 = vmatpush1.bf16.msra.mxu1 %v3726_v0  ;;  %v396_v63 = vrot.slane %v387_v59, %v4393_v38  ;;  %v404_v0 = vrot.slane %v387_v59, %v403_v60  ;;  %v3851_v59 = vld [vmem:[#allocation7 + $0x2e4] ss:$16 sps:$4 sm:$0xff]  }
 0x212   :  { %1733 = vmatprep.subr.bf16.mxu0 %v3731_v1  ;;  %1819 = vmatprep.subr.bf16.mxu1 %v3734_v2 }
 0x215   :  { %1734 = vmatpush1.bf16.msra.mxu0 %v3729_v3  ;;  %1820 = vmatpush1.bf16.msra.mxu1 %v3732_v4 }
 0x216   :  { %1735 = vmatprep.subr.bf16.mxu0 %v3737_v5  ;;  %1821 = vmatprep.subr.bf16.mxu1 %v3740_v6 }
 0x219   :  { %1736 = vmatpush1.bf16.msra.mxu0 %v3735_v7  ;;  %1822 = vmatpush1.bf16.msra.mxu1 %v3738_v8 }
 0x21a   :  { %1737 = vmatprep.subr.bf16.mxu0 %v3743_v9  ;;  %1823 = vmatprep.subr.bf16.mxu1 %v3746_v10 }
 0x21d   :  { %1738 = vmatpush1.bf16.msra.mxu0 %v3741_v11  ;;  %1824 = vmatpush1.bf16.msra.mxu1 %v3744_v12 }
 0x21e   :  { %1739 = vmatprep.subr.bf16.mxu0 %v3749_v13  ;;  %1825 = vmatprep.subr.bf16.mxu1 %v3752_v14 }
 0x221   :  { %1740 = vmatpush1.bf16.msra.mxu0 %v3747_v15  ;;  %1826 = vmatpush1.bf16.msra.mxu1 %v3750_v16 }
 0x222   :  { %1741 = vmatprep.subr.bf16.mxu0 %v3755_v17  ;;  %1827 = vmatprep.subr.bf16.mxu1 %v3758_v18 }
 0x225   :  { %1742 = vmatpush1.bf16.msra.mxu0 %v3753_v19  ;;  %1828 = vmatpush1.bf16.msra.mxu1 %v3756_v20 }
 0x226   :  { %1743 = vmatprep.subr.bf16.mxu0 %v3761_v21  ;;  %1829 = vmatprep.subr.bf16.mxu1 %v3764_v22 }
 0x229   :  { %1744 = vmatpush1.bf16.msra.mxu0 %v3759_v23  ;;  %1830 = vmatpush1.bf16.msra.mxu1 %v3762_v24 }
 0x22a   :  { %1745 = vmatprep.subr.bf16.mxu0 %v3767_v25  ;;  %1831 = vmatprep.subr.bf16.mxu1 %v3770_v26 }
 0x22d   :  { %1746 = vmatpush1.bf16.msra.mxu0 %v3765_v27  ;;  %1832 = vmatpush1.bf16.msra.mxu1 %v3768_v28 }
 0x22e   :  { %1747 = vmatprep.subr.bf16.mxu0 %v3773_v29  ;;  %1833 = vmatprep.subr.bf16.mxu1 %v3776_v30  ;;  %v3807_v29 = vld [vmem:[#allocation7 + $0x200] ss:$16 sps:$4 sm:$0xff]   ;;  %v3810_v30 = vld [vmem:[#allocation7 + $0x208] ss:$16 sps:$4 sm:$0xff]  }
 0x231   :  { %1748 = vmatpush1.bf16.msra.mxu0 %v3771_v31  ;;  %1834 = vmatpush1.bf16.msra.mxu1 %v3774_v32  ;;  %v3815_v31 = vld [vmem:[#allocation7 + $0x224] ss:$16 sps:$4 sm:$0xff]   ;;  %v3818_v32 = vld [vmem:[#allocation7 + $0x22c] ss:$16 sps:$4 sm:$0xff]  }
 0x232   :  { %1749 = vmatprep.subr.bf16.mxu0 %v3779_v33  ;;  %1835 = vmatprep.subr.bf16.mxu1 %v3782_v34  ;;  %v3813_v33 = vld [vmem:[#allocation7 + $0x220] ss:$16 sps:$4 sm:$0xff]   ;;  %v3816_v34 = vld [vmem:[#allocation7 + $0x228] ss:$16 sps:$4 sm:$0xff]  }
 0x235   :  { %1750 = vmatpush1.bf16.msra.mxu0 %v3777_v37  ;;  %1836 = vmatpush1.bf16.msra.mxu1 %v3780_v39  ;;  %v3821_v37 = vld [vmem:[#allocation7 + $0x244] ss:$16 sps:$4 sm:$0xff]   ;;  %v3824_v39 = vld [vmem:[#allocation7 + $0x24c] ss:$16 sps:$4 sm:$0xff]  }
 0x236   :  { %1751 = vmatprep.subr.bf16.mxu0 %v3785_v40  ;;  %1837 = vmatprep.subr.bf16.mxu1 %v3788_v41  ;;  %v3819_v40 = vld [vmem:[#allocation7 + $0x240] ss:$16 sps:$4 sm:$0xff]   ;;  %v3822_v41 = vld [vmem:[#allocation7 + $0x248] ss:$16 sps:$4 sm:$0xff]  }
 0x239   :  { %1752 = vmatpush1.bf16.msra.mxu0 %v3783_v42  ;;  %1838 = vmatpush1.bf16.msra.mxu1 %v3786_v43  ;;  %v3827_v42 = vld [vmem:[#allocation7 + $0x264] ss:$16 sps:$4 sm:$0xff]   ;;  %v3830_v43 = vld [vmem:[#allocation7 + $0x26c] ss:$16 sps:$4 sm:$0xff]  }
 0x23a   :  { %1753 = vmatprep.subr.bf16.mxu0 %v3791_v44  ;;  %1839 = vmatprep.subr.bf16.mxu1 %v3794_v45  ;;  %v3825_v44 = vld [vmem:[#allocation7 + $0x260] ss:$16 sps:$4 sm:$0xff]   ;;  %v3828_v45 = vld [vmem:[#allocation7 + $0x268] ss:$16 sps:$4 sm:$0xff]  }
 0x23d   :  { %1754 = vmatpush1.bf16.msra.mxu0 %v3789_v46  ;;  %1840 = vmatpush1.bf16.msra.mxu1 %v3792_v47  ;;  %v3833_v46 = vld [vmem:[#allocation7 + $0x284] ss:$16 sps:$4 sm:$0xff]   ;;  %v3836_v47 = vld [vmem:[#allocation7 + $0x28c] ss:$16 sps:$4 sm:$0xff]  }
 0x23e   :  { %1755 = vmatprep.subr.bf16.mxu0 %v3797_v48  ;;  %1841 = vmatprep.subr.bf16.mxu1 %v3800_v49  ;;  %v3831_v48 = vld [vmem:[#allocation7 + $0x280] ss:$16 sps:$4 sm:$0xff]   ;;  %v3834_v49 = vld [vmem:[#allocation7 + $0x288] ss:$16 sps:$4 sm:$0xff]  }
 0x241   :  { %1756 = vmatpush1.bf16.msra.mxu0 %v3795_v50  ;;  %1842 = vmatpush1.bf16.msra.mxu1 %v3798_v51  ;;  %v3839_v50 = vld [vmem:[#allocation7 + $0x2a4] ss:$16 sps:$4 sm:$0xff]   ;;  %v3842_v51 = vld [vmem:[#allocation7 + $0x2ac] ss:$16 sps:$4 sm:$0xff]  }
 0x242   :  { %1757 = vmatprep.subr.bf16.mxu0 %v3803_v52  ;;  %1843 = vmatprep.subr.bf16.mxu1 %v3806_v53  ;;  %v3837_v52 = vld [vmem:[#allocation7 + $0x2a0] ss:$16 sps:$4 sm:$0xff]   ;;  %v3840_v53 = vld [vmem:[#allocation7 + $0x2a8] ss:$16 sps:$4 sm:$0xff]  }
 0x245   :  { %1758 = vmatpush1.bf16.msra.mxu0 %v3801_v54  ;;  %1844 = vmatpush1.bf16.msra.mxu1 %v3804_v55  ;;  %v3845_v54 = vld [vmem:[#allocation7 + $0x2c4] ss:$16 sps:$4 sm:$0xff]   ;;  %v3848_v55 = vld [vmem:[#allocation7 + $0x2cc] ss:$16 sps:$4 sm:$0xff]  }
 0x246   :  { %1770 = vmatprep.subr.bf16.mxu0 %v3809_v56  ;;  %1856 = vmatprep.subr.bf16.mxu1 %v3812_v57  ;;  %v3843_v56 = vld [vmem:[#allocation7 + $0x2c0] ss:$16 sps:$4 sm:$0xff]   ;;  %v3846_v57 = vld [vmem:[#allocation7 + $0x2c8] ss:$16 sps:$4 sm:$0xff]  }
 0x2db   :  { %v763_v1 = vpop.f32.mrb[4].mxu0  ;;  %v806_v2 = vpop.f32.mrb[4].mxu1 }
 0x2dc   :  { %v764_v3 = vadd.f32 %v763_v1, %v392_v61  ;;  %v807_v4 = vadd.f32 %v806_v2, %v400_v62  ;;  %v765_v5 = vpop.f32.mrb[5].mxu0  ;;  %v808_v6 = vpop.f32.mrb[5].mxu1  ;;  %v3860_v1 = vld [vmem:[#allocation7 + $0x30c] ss:$16 sps:$4 sm:$0xff]   ;;  %v3855_v2 = vld [vmem:[#allocation7 + $0x300] ss:$16 sps:$4 sm:$0xff]  }
 0x2dd   :  { %v766_v7 = vadd.f32 %v765_v5, %v396_v63  ;;  %v809_v8 = vadd.f32 %v808_v6, %v404_v0  ;;  %v767_v9 = vpop.f32.mrb[6].mxu0  ;;  %v810_v10 = vpop.f32.mrb[6].mxu1  ;;  %v3866_v5 = vld [vmem:[#allocation7 + $0x32c] ss:$16 sps:$4 sm:$0xff]   ;;  %v3861_v6 = vld [vmem:[#allocation7 + $0x320] ss:$16 sps:$4 sm:$0xff]  }
 0x2de   :  { %v768_v11 = vadd.f32 %v767_v9, %v392_v61  ;;  %v811_v12 = vadd.f32 %v810_v10, %v400_v62  ;;  %v769_v13 = vpop.f32.mrb[7].mxu0  ;;  %v812_v14 = vpop.f32.mrb[7].mxu1  ;;  %v815_v17 = vmax.f32 %v764_v3, 0.0  ;;  %v817_v18 = vmax.f32 %v807_v4, 0.0  ;;  %v3854_v61 = vld [vmem:[#allocation7 + $0x2ec] ss:$16 sps:$4 sm:$0xff]  }
 0x2df   :  { %v770_v15 = vadd.f32 %v769_v13, %v396_v63  ;;  %v813_v16 = vadd.f32 %v812_v14, %v404_v0  ;;  %v816_v21 = vmax.f32 %v766_v7, 0.0  ;;  %v818_v22 = vmax.f32 %v809_v8, 0.0  ;;  %v3849_v62 = vld [vmem:[#allocation7 + $0x2e0] ss:$16 sps:$4 sm:$0xff]   ;;  %v3852_v63 = vld [vmem:[#allocation7 + $0x2e8] ss:$16 sps:$4 sm:$0xff]  }
 0x2e0   :  { %v819_v19 = vmax.f32 %v768_v11, 0.0  ;;  %v821_v20 = vmax.f32 %v811_v12, 0.0  ;;  %v3857_v0 = vld [vmem:[#allocation7 + $0x304] ss:$16 sps:$4 sm:$0xff]   ;;  %v3858_v3 = vld [vmem:[#allocation7 + $0x308] ss:$16 sps:$4 sm:$0xff]  }
 0x2e1   :  { %v820_v23 = vmax.f32 %v770_v15, 0.0  ;;  %v822_v24 = vmax.f32 %v813_v16, 0.0  ;;  %v3863_v4 = vld [vmem:[#allocation7 + $0x324] ss:$16 sps:$4 sm:$0xff]   ;;  %v3864_v7 = vld [vmem:[#allocation7 + $0x328] ss:$16 sps:$4 sm:$0xff]  }
 0x2e2   :  { %v955_v25 = vpack.c.bf16 %v819_v19, %v815_v17  ;;  %v4408_v26 = vpack.c.bf16 %v821_v20, %v817_v18  ;;  %v3869_v8 = vld [vmem:[#allocation7 + $0x344] ss:$16 sps:$4 sm:$0xff]   ;;  %v3872_v9 = vld [vmem:[#allocation7 + $0x34c] ss:$16 sps:$4 sm:$0xff]   ;;  %v3867_v10 = vld [vmem:[#allocation7 + $0x340] ss:$16 sps:$4 sm:$0xff]  }
 0x2e3   :  { %v956_v27 = vpack.c.bf16 %v820_v23, %v816_v21  ;;  %v958_v28 = vpack.c.bf16 %v822_v24, %v818_v22  ;;  %v3870_v11 = vld [vmem:[#allocation7 + $0x348] ss:$16 sps:$4 sm:$0xff]   ;;  %v3875_v12 = vld [vmem:[#allocation7 + $0x364] ss:$16 sps:$4 sm:$0xff]   ;;  %v3878_v13 = vld [vmem:[#allocation7 + $0x36c] ss:$16 sps:$4 sm:$0xff]  }
 0x2e4   :  { %v3873_v14 = vld [vmem:[#allocation7 + $0x360] ss:$16 sps:$4 sm:$0xff]   ;;  %v3876_v15 = vld [vmem:[#allocation7 + $0x368] ss:$16 sps:$4 sm:$0xff]   ;;  %v3881_v16 = vld [vmem:[#allocation7 + $0x384] ss:$16 sps:$4 sm:$0xff]  }
 0x2e5   :  { %1759 = vmatprep.mubr.bf16.mxu0 %v956_v27  ;;  %1845 = vmatprep.mubr.bf16.mxu1 %v956_v27  ;;  %v3884_v17 = vld [vmem:[#allocation7 + $0x38c] ss:$16 sps:$4 sm:$0xff]   ;;  %v3879_v18 = vld [vmem:[#allocation7 + $0x380] ss:$16 sps:$4 sm:$0xff]   ;;  %v3882_v19 = vld [vmem:[#allocation7 + $0x388] ss:$16 sps:$4 sm:$0xff]  }
 0x2e6   :  { %1760 = vmatmul.mubr.bf16.vlgmr.msra.gmra.mrb[8].mxu0 %v955_v25  ;;  %1846 = vmatmul.mubr.bf16.vlgmr.msra.gmra.mrb[8].mxu1 %v955_v25  ;;  %v3887_v20 = vld [vmem:[#allocation7 + $0x3a4] ss:$16 sps:$4 sm:$0xff]   ;;  %v3890_v21 = vld [vmem:[#allocation7 + $0x3ac] ss:$16 sps:$4 sm:$0xff]   ;;  %v3885_v22 = vld [vmem:[#allocation7 + $0x3a0] ss:$16 sps:$4 sm:$0xff]  }
 0x2e7   :  { %1771 = vmatpush1.bf16.msra.mxu0 %v3807_v29  ;;  %1857 = vmatpush1.bf16.msra.mxu1 %v3810_v30  ;;  %v3888_v23 = vld [vmem:[#allocation7 + $0x3a8] ss:$16 sps:$4 sm:$0xff]   ;;  %v3893_v24 = vld [vmem:[#allocation7 + $0x3c4] ss:$16 sps:$4 sm:$0xff]   ;;  %v3896_v25 = vld [vmem:[#allocation7 + $0x3cc] ss:$16 sps:$4 sm:$0xff]  }
 0x2e8   :  { %1802 = vmatprep.mubr.bf16.mxu0 %v958_v28  ;;  %1888 = vmatprep.mubr.bf16.mxu1 %v958_v28  ;;  %v3891_v27 = vld [vmem:[#allocation7 + $0x3c0] ss:$16 sps:$4 sm:$0xff]   ;;  %v3894_v28 = vld [vmem:[#allocation7 + $0x3c8] ss:$16 sps:$4 sm:$0xff]   ;;  %v3899_v29 = vld [vmem:[#allocation7 + $0x3e4] ss:$16 sps:$4 sm:$0xff]  }
 0x2e9   :  { %1772 = vmatprep.subr.bf16.mxu0 %v3815_v31  ;;  %1858 = vmatprep.subr.bf16.mxu1 %v3818_v32  ;;  %v3902_v30 = vld [vmem:[#allocation7 + $0x3ec] ss:$16 sps:$4 sm:$0xff]   ;;  %v3897_v31 = vld [vmem:[#allocation7 + $0x3e0] ss:$16 sps:$4 sm:$0xff]   ;;  %v3900_v32 = vld [vmem:[#allocation7 + $0x3e8] ss:$16 sps:$4 sm:$0xff]  }
 0x2eb   :  { %1773 = vmatpush1.bf16.msra.mxu0 %v3813_v33  ;;  %1859 = vmatpush1.bf16.msra.mxu1 %v3816_v34  ;;  %v3905_v33 = vld [vmem:[#allocation6 + $0x4] ss:$16 sps:$4 sm:$0xff]   ;;  %v3908_v34 = vld [vmem:[#allocation6 + $0xc] ss:$16 sps:$4 sm:$0xff]  }
 0x2ec   :  { %1774 = vmatprep.subr.bf16.mxu0 %v3821_v37  ;;  %1860 = vmatprep.subr.bf16.mxu1 %v3824_v39  ;;  %v3903_v37 = vld [vmem:[#allocation6] ss:$16 sps:$4 sm:$0xff]   ;;  %v3906_v39 = vld [vmem:[#allocation6 + $0x8] ss:$16 sps:$4 sm:$0xff]  }
 0x2ef   :  { %1775 = vmatpush1.bf16.msra.mxu0 %v3819_v40  ;;  %1861 = vmatpush1.bf16.msra.mxu1 %v3822_v41  ;;  %v3911_v40 = vld [vmem:[#allocation6 + $0x24] ss:$16 sps:$4 sm:$0xff]   ;;  %v3914_v41 = vld [vmem:[#allocation6 + $0x2c] ss:$16 sps:$4 sm:$0xff]  }
 0x2f0   :  { %1776 = vmatprep.subr.bf16.mxu0 %v3827_v42  ;;  %1862 = vmatprep.subr.bf16.mxu1 %v3830_v43  ;;  %v4001_v42 = vld [vmem:[%s4538_s0 + $0x4] ss:$16 sps:$4 sm:$0xff]   ;;  %v3909_v43 = vld [vmem:[#allocation6 + $0x20] ss:$16 sps:$4 sm:$0xff]  }
 0x2f3   :  { %1777 = vmatpush1.bf16.msra.mxu0 %v3825_v44  ;;  %1863 = vmatpush1.bf16.msra.mxu1 %v3828_v45  ;;  %v3912_v44 = vld [vmem:[#allocation6 + $0x28] ss:$16 sps:$4 sm:$0xff]   ;;  %v3917_v45 = vld [vmem:[#allocation6 + $0x44] ss:$16 sps:$4 sm:$0xff]  }
 0x2f4   :  { %1778 = vmatprep.subr.bf16.mxu0 %v3833_v46  ;;  %1864 = vmatprep.subr.bf16.mxu1 %v3836_v47  ;;  %v3920_v46 = vld [vmem:[#allocation6 + $0x4c] ss:$16 sps:$4 sm:$0xff]   ;;  %v3915_v47 = vld [vmem:[#allocation6 + $0x40] ss:$16 sps:$4 sm:$0xff]  }
 0x2f7   :  { %1779 = vmatpush1.bf16.msra.mxu0 %v3831_v48  ;;  %1865 = vmatpush1.bf16.msra.mxu1 %v3834_v49  ;;  %v3918_v48 = vld [vmem:[#allocation6 + $0x48] ss:$16 sps:$4 sm:$0xff]   ;;  %v3923_v49 = vld [vmem:[#allocation6 + $0x64] ss:$16 sps:$4 sm:$0xff]  }
 0x2f8   :  { %1780 = vmatprep.subr.bf16.mxu0 %v3839_v50  ;;  %1866 = vmatprep.subr.bf16.mxu1 %v3842_v51  ;;  %v3926_v50 = vld [vmem:[#allocation6 + $0x6c] ss:$16 sps:$4 sm:$0xff]   ;;  %v3924_v51 = vld [vmem:[#allocation6 + $0x68] ss:$16 sps:$4 sm:$0xff]  }
 0x2fb   :  { %1781 = vmatpush1.bf16.msra.mxu0 %v3837_v52  ;;  %1867 = vmatpush1.bf16.msra.mxu1 %v3840_v53  ;;  %v3929_v52 = vld [vmem:[#allocation6 + $0x84] ss:$16 sps:$4 sm:$0xff]   ;;  %v3932_v53 = vld [vmem:[#allocation6 + $0x8c] ss:$16 sps:$4 sm:$0xff]  }
 0x2fc   :  { %1782 = vmatprep.subr.bf16.mxu0 %v3845_v54  ;;  %1868 = vmatprep.subr.bf16.mxu1 %v3848_v55  ;;  %v3927_v54 = vld [vmem:[#allocation6 + $0x80] ss:$16 sps:$4 sm:$0xff]   ;;  %v3930_v55 = vld [vmem:[#allocation6 + $0x88] ss:$16 sps:$4 sm:$0xff]  }
 0x2ff   :  { %1783 = vmatpush1.bf16.msra.mxu0 %v3843_v56  ;;  %1869 = vmatpush1.bf16.msra.mxu1 %v3846_v57  ;;  %v3935_v56 = vld [vmem:[#allocation6 + $0xa4] ss:$16 sps:$4 sm:$0xff]   ;;  %v3938_v57 = vld [vmem:[#allocation6 + $0xac] ss:$16 sps:$4 sm:$0xff]  }
 0x300   :  { %1784 = vmatprep.subr.bf16.mxu0 %v3851_v59  ;;  %1870 = vmatprep.subr.bf16.mxu1 %v3854_v61  ;;  %v3933_v59 = vld [vmem:[#allocation6 + $0xa0] ss:$16 sps:$4 sm:$0xff]   ;;  %v3936_v61 = vld [vmem:[#allocation6 + $0xa8] ss:$16 sps:$4 sm:$0xff]  }
 0x303   :  { %1785 = vmatpush1.bf16.msra.mxu0 %v3849_v62  ;;  %1871 = vmatpush1.bf16.msra.mxu1 %v3852_v63  ;;  %v3941_v62 = vld [vmem:[#allocation6 + $0xc4] ss:$16 sps:$4 sm:$0xff]   ;;  %v3944_v63 = vld [vmem:[#allocation6 + $0xcc] ss:$16 sps:$4 sm:$0xff]  }
 0x304   :  { %1786 = vmatprep.subr.bf16.mxu0 %v3857_v0  ;;  %1872 = vmatprep.subr.bf16.mxu1 %v3860_v1  ;;  %v3939_v0 = vld [vmem:[#allocation6 + $0xc0] ss:$16 sps:$4 sm:$0xff]   ;;  %v3942_v1 = vld [vmem:[#allocation6 + $0xc8] ss:$16 sps:$4 sm:$0xff]  }
 0x307   :  { %1787 = vmatpush1.bf16.msra.mxu0 %v3855_v2  ;;  %1873 = vmatpush1.bf16.msra.mxu1 %v3858_v3  ;;  %v3947_v2 = vld [vmem:[#allocation6 + $0xe4] ss:$16 sps:$4 sm:$0xff]   ;;  %v3950_v3 = vld [vmem:[#allocation6 + $0xec] ss:$16 sps:$4 sm:$0xff]  }
 0x308   :  { %1788 = vmatprep.subr.bf16.mxu0 %v3863_v4  ;;  %1874 = vmatprep.subr.bf16.mxu1 %v3866_v5  ;;  %v3945_v4 = vld [vmem:[#allocation6 + $0xe0] ss:$16 sps:$4 sm:$0xff]   ;;  %v3948_v5 = vld [vmem:[#allocation6 + $0xe8] ss:$16 sps:$4 sm:$0xff]  }
 0x30b   :  { %1789 = vmatpush1.bf16.msra.mxu0 %v3861_v6  ;;  %1875 = vmatpush1.bf16.msra.mxu1 %v3864_v7  ;;  %v3953_v6 = vld [vmem:[#allocation6 + $0x104] ss:$16 sps:$4 sm:$0xff]   ;;  %v3956_v7 = vld [vmem:[#allocation6 + $0x10c] ss:$16 sps:$4 sm:$0xff]  }
 0x30c   :  { %1790 = vmatprep.subr.bf16.mxu0 %v3869_v8  ;;  %1876 = vmatprep.subr.bf16.mxu1 %v3872_v9  ;;  %v3951_v8 = vld [vmem:[#allocation6 + $0x100] ss:$16 sps:$4 sm:$0xff]   ;;  %v3954_v9 = vld [vmem:[#allocation6 + $0x108] ss:$16 sps:$4 sm:$0xff]  }
 0x30f   :  { %1791 = vmatpush1.bf16.msra.mxu0 %v3867_v10  ;;  %1877 = vmatpush1.bf16.msra.mxu1 %v3870_v11  ;;  %v3959_v10 = vld [vmem:[#allocation6 + $0x124] ss:$16 sps:$4 sm:$0xff]   ;;  %v3962_v11 = vld [vmem:[#allocation6 + $0x12c] ss:$16 sps:$4 sm:$0xff]  }
 0x310   :  { %1792 = vmatprep.subr.bf16.mxu0 %v3875_v12  ;;  %1878 = vmatprep.subr.bf16.mxu1 %v3878_v13  ;;  %v3957_v12 = vld [vmem:[#allocation6 + $0x120] ss:$16 sps:$4 sm:$0xff]   ;;  %v3960_v13 = vld [vmem:[#allocation6 + $0x128] ss:$16 sps:$4 sm:$0xff]  }
 0x313   :  { %1793 = vmatpush1.bf16.msra.mxu0 %v3873_v14  ;;  %1879 = vmatpush1.bf16.msra.mxu1 %v3876_v15  ;;  %v3965_v14 = vld [vmem:[#allocation6 + $0x144] ss:$16 sps:$4 sm:$0xff]   ;;  %v3968_v15 = vld [vmem:[#allocation6 + $0x14c] ss:$16 sps:$4 sm:$0xff]  }
 0x314   :  { %1794 = vmatprep.subr.bf16.mxu0 %v3881_v16  ;;  %1880 = vmatprep.subr.bf16.mxu1 %v3884_v17  ;;  %v3963_v16 = vld [vmem:[#allocation6 + $0x140] ss:$16 sps:$4 sm:$0xff]   ;;  %v3966_v17 = vld [vmem:[#allocation6 + $0x148] ss:$16 sps:$4 sm:$0xff]  }
 0x317   :  { %1795 = vmatpush1.bf16.msra.mxu0 %v3879_v18  ;;  %1881 = vmatpush1.bf16.msra.mxu1 %v3882_v19  ;;  %v3971_v18 = vld [vmem:[#allocation6 + $0x164] ss:$16 sps:$4 sm:$0xff]   ;;  %v3974_v19 = vld [vmem:[#allocation6 + $0x16c] ss:$16 sps:$4 sm:$0xff]  }
 0x318   :  { %1796 = vmatprep.subr.bf16.mxu0 %v3887_v20  ;;  %1882 = vmatprep.subr.bf16.mxu1 %v3890_v21  ;;  %v3969_v20 = vld [vmem:[#allocation6 + $0x160] ss:$16 sps:$4 sm:$0xff]   ;;  %v3972_v21 = vld [vmem:[#allocation6 + $0x168] ss:$16 sps:$4 sm:$0xff]  }
 0x31b   :  { %1797 = vmatpush1.bf16.msra.mxu0 %v3885_v22  ;;  %1883 = vmatpush1.bf16.msra.mxu1 %v3888_v23  ;;  %v3977_v22 = vld [vmem:[#allocation6 + $0x184] ss:$16 sps:$4 sm:$0xff]   ;;  %v3980_v23 = vld [vmem:[#allocation6 + $0x18c] ss:$16 sps:$4 sm:$0xff]  }
 0x31c   :  { %1798 = vmatprep.subr.bf16.mxu0 %v3893_v24  ;;  %1884 = vmatprep.subr.bf16.mxu1 %v3896_v25  ;;  %v3975_v24 = vld [vmem:[#allocation6 + $0x180] ss:$16 sps:$4 sm:$0xff]   ;;  %v3978_v25 = vld [vmem:[#allocation6 + $0x188] ss:$16 sps:$4 sm:$0xff]  }
 0x31f   :  { %1799 = vmatpush1.bf16.msra.mxu0 %v3891_v27  ;;  %1885 = vmatpush1.bf16.msra.mxu1 %v3894_v28  ;;  %v3983_v27 = vld [vmem:[#allocation6 + $0x1a4] ss:$16 sps:$4 sm:$0xff]   ;;  %v3986_v28 = vld [vmem:[#allocation6 + $0x1ac] ss:$16 sps:$4 sm:$0xff]  }
 0x320   :  { %1800 = vmatprep.subr.bf16.mxu0 %v3899_v29  ;;  %1886 = vmatprep.subr.bf16.mxu1 %v3902_v30  ;;  %v3981_v29 = vld [vmem:[#allocation6 + $0x1a0] ss:$16 sps:$4 sm:$0xff]   ;;  %v3984_v30 = vld [vmem:[#allocation6 + $0x1a8] ss:$16 sps:$4 sm:$0xff]  }
 0x323   :  { %1801 = vmatpush1.bf16.msra.mxu0 %v3897_v31  ;;  %1887 = vmatpush1.bf16.msra.mxu1 %v3900_v32  ;;  %v3989_v31 = vld [vmem:[#allocation6 + $0x1c4] ss:$16 sps:$4 sm:$0xff]   ;;  %v3992_v32 = vld [vmem:[#allocation6 + $0x1cc] ss:$16 sps:$4 sm:$0xff]  }
 0x324   :  { %2559 = vmatprep.subr.bf16.mxu0 %v3905_v33  ;;  %2645 = vmatprep.subr.bf16.mxu1 %v3908_v34  ;;  %v3987_v33 = vld [vmem:[#allocation6 + $0x1c0] ss:$16 sps:$4 sm:$0xff]   ;;  %v3990_v34 = vld [vmem:[#allocation6 + $0x1c8] ss:$16 sps:$4 sm:$0xff]  }
 0x326   :  { %1803 = vmatmul.mubr.bf16.vlgmr.msra.gmra.mrb[8].mxu0 %v4408_v26  ;;  %1889 = vmatmul.mubr.bf16.vlgmr.msra.gmra.mrb[8].mxu1 %v4408_v26  ;;  %v3921_v26 = vld [vmem:[#allocation6 + $0x60] ss:$16 sps:$4 sm:$0xff]  }
 0x327   :  { %2560 = vmatpush1.bf16.msra.mxu0 %v3903_v37  ;;  %2646 = vmatpush1.bf16.msra.mxu1 %v3906_v39  ;;  %v3995_v37 = vld [vmem:[#allocation6 + $0x1e4] ss:$16 sps:$4 sm:$0xff]   ;;  %v3998_v39 = vld [vmem:[#allocation6 + $0x1ec] ss:$16 sps:$4 sm:$0xff]  }
 0x328   :  { %2561 = vmatprep.subr.bf16.mxu0 %v3911_v40  ;;  %2647 = vmatprep.subr.bf16.mxu1 %v3914_v41  ;;  %v3993_v40 = vld [vmem:[#allocation6 + $0x1e0] ss:$16 sps:$4 sm:$0xff]   ;;  %v3996_v41 = vld [vmem:[#allocation6 + $0x1e8] ss:$16 sps:$4 sm:$0xff]  }
 0x329   :  { %2591 = vmatprep.mubr.bf16.mxu0 %v4001_v42  ;;  %2677 = vmatprep.mubr.bf16.mxu1 %v4001_v42  ;;  %v4004_v42 = vld [vmem:[#allocation6 + $0x204] ss:$16 sps:$4 sm:$0xff]  }
 0x32b   :  { %2562 = vmatpush1.bf16.msra.mxu0 %v3909_v43  ;;  %2648 = vmatpush1.bf16.msra.mxu1 %v3912_v44  ;;  %v4007_v43 = vld [vmem:[#allocation6 + $0x20c] ss:$16 sps:$4 sm:$0xff]   ;;  %v3999_v44 = vld [vmem:[%s4538_s0] ss:$16 sps:$4 sm:$0xff]  }
 0x32c   :  { %2563 = vmatprep.subr.bf16.mxu0 %v3917_v45  ;;  %2649 = vmatprep.subr.bf16.mxu1 %v3920_v46  ;;  %v4002_v45 = vld [vmem:[#allocation6 + $0x200] ss:$16 sps:$4 sm:$0xff]   ;;  %v4005_v46 = vld [vmem:[#allocation6 + $0x208] ss:$16 sps:$4 sm:$0xff]  }
 0x32f   :  { %2564 = vmatpush1.bf16.msra.mxu0 %v3915_v47  ;;  %2650 = vmatpush1.bf16.msra.mxu1 %v3918_v48  ;;  %v4010_v47 = vld [vmem:[#allocation6 + $0x224] ss:$16 sps:$4 sm:$0xff]   ;;  %v4013_v48 = vld [vmem:[#allocation6 + $0x22c] ss:$16 sps:$4 sm:$0xff]  }
 0x330   :  { %2565 = vmatprep.subr.bf16.mxu0 %v3923_v49  ;;  %2651 = vmatprep.subr.bf16.mxu1 %v3926_v50  ;;  %v4100_v49 = vld [vmem:[%s4538_s0 + $0xc] ss:$16 sps:$4 sm:$0xff]   ;;  %v4008_v50 = vld [vmem:[#allocation6 + $0x220] ss:$16 sps:$4 sm:$0xff]  }
 0x333   :  { %2566 = vmatpush1.bf16.msra.mxu0 %v3921_v26  ;;  %2652 = vmatpush1.bf16.msra.mxu1 %v3924_v51  ;;  %v4011_v26 = vld [vmem:[#allocation6 + $0x228] ss:$16 sps:$4 sm:$0xff]   ;;  %v4016_v51 = vld [vmem:[#allocation6 + $0x244] ss:$16 sps:$4 sm:$0xff]  }
 0x334   :  { %2567 = vmatprep.subr.bf16.mxu0 %v3929_v52  ;;  %2653 = vmatprep.subr.bf16.mxu1 %v3932_v53  ;;  %v4019_v52 = vld [vmem:[#allocation6 + $0x24c] ss:$16 sps:$4 sm:$0xff]   ;;  %v4014_v53 = vld [vmem:[#allocation6 + $0x240] ss:$16 sps:$4 sm:$0xff]  }
 0x337   :  { %2568 = vmatpush1.bf16.msra.mxu0 %v3927_v54  ;;  %2654 = vmatpush1.bf16.msra.mxu1 %v3930_v55  ;;  %v4017_v54 = vld [vmem:[#allocation6 + $0x248] ss:$16 sps:$4 sm:$0xff]   ;;  %v4022_v55 = vld [vmem:[#allocation6 + $0x264] ss:$16 sps:$4 sm:$0xff]  }
 0x338   :  { %2569 = vmatprep.subr.bf16.mxu0 %v3935_v56  ;;  %2655 = vmatprep.subr.bf16.mxu1 %v3938_v57  ;;  %v4025_v56 = vld [vmem:[#allocation6 + $0x26c] ss:$16 sps:$4 sm:$0xff]   ;;  %v4020_v57 = vld [vmem:[#allocation6 + $0x260] ss:$16 sps:$4 sm:$0xff]  }
 0x33b   :  { %2570 = vmatpush1.bf16.msra.mxu0 %v3933_v59  ;;  %2656 = vmatpush1.bf16.msra.mxu1 %v3936_v61  ;;  %v4023_v59 = vld [vmem:[#allocation6 + $0x268] ss:$16 sps:$4 sm:$0xff]   ;;  %v4028_v61 = vld [vmem:[#allocation6 + $0x284] ss:$16 sps:$4 sm:$0xff]  }
 0x33c   :  { %2571 = vmatprep.subr.bf16.mxu0 %v3941_v62  ;;  %2657 = vmatprep.subr.bf16.mxu1 %v3944_v63  ;;  %v4031_v62 = vld [vmem:[#allocation6 + $0x28c] ss:$16 sps:$4 sm:$0xff]   ;;  %v4026_v63 = vld [vmem:[#allocation6 + $0x280] ss:$16 sps:$4 sm:$0xff]  }
 0x33f   :  { %2572 = vmatpush1.bf16.msra.mxu0 %v3939_v0  ;;  %2658 = vmatpush1.bf16.msra.mxu1 %v3942_v1  ;;  %v4029_v0 = vld [vmem:[#allocation6 + $0x288] ss:$16 sps:$4 sm:$0xff]   ;;  %v4034_v1 = vld [vmem:[#allocation6 + $0x2a4] ss:$16 sps:$4 sm:$0xff]  }
 0x340   :  { %2573 = vmatprep.subr.bf16.mxu0 %v3947_v2  ;;  %2659 = vmatprep.subr.bf16.mxu1 %v3950_v3  ;;  %v4037_v2 = vld [vmem:[#allocation6 + $0x2ac] ss:$16 sps:$4 sm:$0xff]   ;;  %v4032_v3 = vld [vmem:[#allocation6 + $0x2a0] ss:$16 sps:$4 sm:$0xff]  }
 0x343   :  { %2574 = vmatpush1.bf16.msra.mxu0 %v3945_v4  ;;  %2660 = vmatpush1.bf16.msra.mxu1 %v3948_v5  ;;  %v4035_v4 = vld [vmem:[#allocation6 + $0x2a8] ss:$16 sps:$4 sm:$0xff]   ;;  %v4040_v5 = vld [vmem:[#allocation6 + $0x2c4] ss:$16 sps:$4 sm:$0xff]  }
 0x344   :  { %2575 = vmatprep.subr.bf16.mxu0 %v3953_v6  ;;  %2661 = vmatprep.subr.bf16.mxu1 %v3956_v7  ;;  %v4043_v6 = vld [vmem:[#allocation6 + $0x2cc] ss:$16 sps:$4 sm:$0xff]   ;;  %v4038_v7 = vld [vmem:[#allocation6 + $0x2c0] ss:$16 sps:$4 sm:$0xff]  }
 0x347   :  { %2576 = vmatpush1.bf16.msra.mxu0 %v3951_v8  ;;  %2662 = vmatpush1.bf16.msra.mxu1 %v3954_v9  ;;  %v4041_v8 = vld [vmem:[#allocation6 + $0x2c8] ss:$16 sps:$4 sm:$0xff]   ;;  %v4046_v9 = vld [vmem:[#allocation6 + $0x2e4] ss:$16 sps:$4 sm:$0xff]  }
 0x348   :  { %2577 = vmatprep.subr.bf16.mxu0 %v3959_v10  ;;  %2663 = vmatprep.subr.bf16.mxu1 %v3962_v11  ;;  %v4049_v10 = vld [vmem:[#allocation6 + $0x2ec] ss:$16 sps:$4 sm:$0xff]   ;;  %v4044_v11 = vld [vmem:[#allocation6 + $0x2e0] ss:$16 sps:$4 sm:$0xff]  }
 0x34b   :  { %2578 = vmatpush1.bf16.msra.mxu0 %v3957_v12  ;;  %2664 = vmatpush1.bf16.msra.mxu1 %v3960_v13  ;;  %v4047_v12 = vld [vmem:[#allocation6 + $0x2e8] ss:$16 sps:$4 sm:$0xff]   ;;  %v4052_v13 = vld [vmem:[#allocation6 + $0x304] ss:$16 sps:$4 sm:$0xff]  }
 0x34c   :  { %2579 = vmatprep.subr.bf16.mxu0 %v3965_v14  ;;  %2665 = vmatprep.subr.bf16.mxu1 %v3968_v15  ;;  %v4055_v14 = vld [vmem:[#allocation6 + $0x30c] ss:$16 sps:$4 sm:$0xff]   ;;  %v4050_v15 = vld [vmem:[#allocation6 + $0x300] ss:$16 sps:$4 sm:$0xff]  }
 0x34f   :  { %2580 = vmatpush1.bf16.msra.mxu0 %v3963_v16  ;;  %2666 = vmatpush1.bf16.msra.mxu1 %v3966_v17  ;;  %v4053_v16 = vld [vmem:[#allocation6 + $0x308] ss:$16 sps:$4 sm:$0xff]   ;;  %v4058_v17 = vld [vmem:[#allocation6 + $0x324] ss:$16 sps:$4 sm:$0xff]  }
 0x350   :  { %2581 = vmatprep.subr.bf16.mxu0 %v3971_v18  ;;  %2667 = vmatprep.subr.bf16.mxu1 %v3974_v19  ;;  %v4061_v18 = vld [vmem:[#allocation6 + $0x32c] ss:$16 sps:$4 sm:$0xff]   ;;  %v4056_v19 = vld [vmem:[#allocation6 + $0x320] ss:$16 sps:$4 sm:$0xff]  }
 0x353   :  { %2582 = vmatpush1.bf16.msra.mxu0 %v3969_v20  ;;  %2668 = vmatpush1.bf16.msra.mxu1 %v3972_v21  ;;  %v4059_v20 = vld [vmem:[#allocation6 + $0x328] ss:$16 sps:$4 sm:$0xff]   ;;  %v4064_v21 = vld [vmem:[#allocation6 + $0x344] ss:$16 sps:$4 sm:$0xff]  }
 0x354   :  { %2583 = vmatprep.subr.bf16.mxu0 %v3977_v22  ;;  %2669 = vmatprep.subr.bf16.mxu1 %v3980_v23  ;;  %v4067_v22 = vld [vmem:[#allocation6 + $0x34c] ss:$16 sps:$4 sm:$0xff]   ;;  %v4062_v23 = vld [vmem:[#allocation6 + $0x340] ss:$16 sps:$4 sm:$0xff]  }
 0x357   :  { %2584 = vmatpush1.bf16.msra.mxu0 %v3975_v24  ;;  %2670 = vmatpush1.bf16.msra.mxu1 %v3978_v25  ;;  %v4065_v24 = vld [vmem:[#allocation6 + $0x348] ss:$16 sps:$4 sm:$0xff]   ;;  %v4070_v25 = vld [vmem:[#allocation6 + $0x364] ss:$16 sps:$4 sm:$0xff]  }
 0x358   :  { %2585 = vmatprep.subr.bf16.mxu0 %v3983_v27  ;;  %2671 = vmatprep.subr.bf16.mxu1 %v3986_v28  ;;  %v4073_v27 = vld [vmem:[#allocation6 + $0x36c] ss:$16 sps:$4 sm:$0xff]   ;;  %v4068_v28 = vld [vmem:[#allocation6 + $0x360] ss:$16 sps:$4 sm:$0xff]  }
 0x35b   :  { %2586 = vmatpush1.bf16.msra.mxu0 %v3981_v29  ;;  %2672 = vmatpush1.bf16.msra.mxu1 %v3984_v30  ;;  %v4071_v29 = vld [vmem:[#allocation6 + $0x368] ss:$16 sps:$4 sm:$0xff]   ;;  %v4076_v30 = vld [vmem:[#allocation6 + $0x384] ss:$16 sps:$4 sm:$0xff]  }
 0x35c   :  { %2587 = vmatprep.subr.bf16.mxu0 %v3989_v31  ;;  %2673 = vmatprep.subr.bf16.mxu1 %v3992_v32  ;;  %v4079_v31 = vld [vmem:[#allocation6 + $0x38c] ss:$16 sps:$4 sm:$0xff]   ;;  %v4074_v32 = vld [vmem:[#allocation6 + $0x380] ss:$16 sps:$4 sm:$0xff]  }
 0x35f   :  { %2588 = vmatpush1.bf16.msra.mxu0 %v3987_v33  ;;  %2674 = vmatpush1.bf16.msra.mxu1 %v3990_v34  ;;  %v4077_v33 = vld [vmem:[#allocation6 + $0x388] ss:$16 sps:$4 sm:$0xff]   ;;  %v4082_v34 = vld [vmem:[#allocation6 + $0x3a4] ss:$16 sps:$4 sm:$0xff]  }
 0x360   :  { %2589 = vmatprep.subr.bf16.mxu0 %v3995_v37  ;;  %2675 = vmatprep.subr.bf16.mxu1 %v3998_v39  ;;  %v4085_v37 = vld [vmem:[#allocation6 + $0x3ac] ss:$16 sps:$4 sm:$0xff]   ;;  %v4080_v39 = vld [vmem:[#allocation6 + $0x3a0] ss:$16 sps:$4 sm:$0xff]  }
 0x363   :  { %2590 = vmatpush1.bf16.msra.mxu0 %v3993_v40  ;;  %2676 = vmatpush1.bf16.msra.mxu1 %v3996_v41  ;;  %v4083_v40 = vld [vmem:[#allocation6 + $0x3a8] ss:$16 sps:$4 sm:$0xff]   ;;  %v4088_v41 = vld [vmem:[#allocation6 + $0x3c4] ss:$16 sps:$4 sm:$0xff]  }
 0x364   :  { %2602 = vmatprep.subr.bf16.mxu0 %v4004_v42  ;;  %2688 = vmatprep.subr.bf16.mxu1 %v4007_v43  ;;  %v4091_v42 = vld [vmem:[#allocation6 + $0x3cc] ss:$16 sps:$4 sm:$0xff]   ;;  %v4086_v43 = vld [vmem:[#allocation6 + $0x3c0] ss:$16 sps:$4 sm:$0xff]  }
 0x366   :  { %2592 = vmatmul.mubr.bf16.vlgmr.msra.gmra.mrb[8].mxu0 %v3999_v44  ;;  %2678 = vmatmul.mubr.bf16.vlgmr.msra.gmra.mrb[8].mxu1 %v3999_v44  ;;  %v4089_v44 = vld [vmem:[#allocation6 + $0x3c8] ss:$16 sps:$4 sm:$0xff]  }
 0x367   :  { %2603 = vmatpush1.bf16.msra.mxu0 %v4002_v45  ;;  %2689 = vmatpush1.bf16.msra.mxu1 %v4005_v46  ;;  %v4094_v45 = vld [vmem:[#allocation6 + $0x3e4] ss:$16 sps:$4 sm:$0xff]   ;;  %v4097_v46 = vld [vmem:[#allocation6 + $0x3ec] ss:$16 sps:$4 sm:$0xff]  }
 0x368   :  { %2604 = vmatprep.subr.bf16.mxu0 %v4010_v47  ;;  %2690 = vmatprep.subr.bf16.mxu1 %v4013_v48  ;;  %v4092_v47 = vld [vmem:[#allocation6 + $0x3e0] ss:$16 sps:$4 sm:$0xff]   ;;  %v4095_v48 = vld [vmem:[#allocation6 + $0x3e8] ss:$16 sps:$4 sm:$0xff]  }
 0x369   :  { %2634 = vmatprep.mubr.bf16.mxu0 %v4100_v49  ;;  %2720 = vmatprep.mubr.bf16.mxu1 %v4100_v49  ;;  %v4101_v49 = vld [vmem:[%s4549_s11 + $0x40] sm:$0xff]  }
 0x36b   :  { %2605 = vmatpush1.bf16.msra.mxu0 %v4008_v50  ;;  %2691 = vmatpush1.bf16.msra.mxu1 %v4011_v26  ;;  %v4102_v50 = vld [vmem:[%s4549_s11 + $0xc0] sm:$0xff]   ;;  %v4098_v26 = vld [vmem:[%s4538_s0 + $0x8] ss:$16 sps:$4 sm:$0xff]  }
 0x36c   :  { %2606 = vmatprep.subr.bf16.mxu0 %v4016_v51  ;;  %2692 = vmatprep.subr.bf16.mxu1 %v4019_v52  ;;  %v4103_v51 = vld [vmem:[%s4549_s11] sm:$0xff]  }
 0x36d   :  { %v4104_v52 = vld [vmem:[%s4549_s11 + $0x80] sm:$0xff]  }
 0x36f   :  { %2607 = vmatpush1.bf16.msra.mxu0 %v4014_v53  ;;  %2693 = vmatpush1.bf16.msra.mxu1 %v4017_v54  ;;  %v4105_v53 = vld [vmem:[%s4549_s11 + $0x48] sm:$0xff]  }
 0x370   :  { %2608 = vmatprep.subr.bf16.mxu0 %v4022_v55  ;;  %2694 = vmatprep.subr.bf16.mxu1 %v4025_v56  ;;  %v4106_v54 = vld [vmem:[%s4549_s11 + $0xc8] sm:$0xff]  }
 0x371   :  { %v4107_v55 = vld [vmem:[%s4549_s11 + $0x8] sm:$0xff]  }
 0x372   :  { %v4108_v56 = vld [vmem:[%s4549_s11 + $0x88] sm:$0xff]  }
 0x373   :  { %2609 = vmatpush1.bf16.msra.mxu0 %v4020_v57  ;;  %2695 = vmatpush1.bf16.msra.mxu1 %v4023_v59  ;;  %v4109_v57 = vld [vmem:[%s4549_s11 + $0x50] sm:$0xff]  }
 0x374   :  { %2610 = vmatprep.subr.bf16.mxu0 %v4028_v61  ;;  %2696 = vmatprep.subr.bf16.mxu1 %v4031_v62  ;;  %v4110_v59 = vld [vmem:[%s4549_s11 + $0xd0] sm:$0xff]  }
 0x375   :  { %v4111_v61 = vld [vmem:[%s4549_s11 + $0x10] sm:$0xff]  }
 0x376   :  { %v4112_v62 = vld [vmem:[%s4549_s11 + $0x90] sm:$0xff]  }
 0x377   :  { %2611 = vmatpush1.bf16.msra.mxu0 %v4026_v63  ;;  %2697 = vmatpush1.bf16.msra.mxu1 %v4029_v0  ;;  %v4113_v63 = vld [vmem:[%s4549_s11 + $0x58] sm:$0xff]  }
 0x378   :  { %2612 = vmatprep.subr.bf16.mxu0 %v4034_v1  ;;  %2698 = vmatprep.subr.bf16.mxu1 %v4037_v2  ;;  %v4114_v0 = vld [vmem:[%s4549_s11 + $0xd8] sm:$0xff]  }
 0x379   :  { %v4115_v1 = vld [vmem:[%s4549_s11 + $0x18] sm:$0xff]  }
 0x37a   :  { %v4116_v2 = vld [vmem:[%s4549_s11 + $0x98] sm:$0xff]  }
 0x37b   :  { %2613 = vmatpush1.bf16.msra.mxu0 %v4032_v3  ;;  %2699 = vmatpush1.bf16.msra.mxu1 %v4035_v4  ;;  %v4117_v3 = vld [vmem:[%s4549_s11 + $0x60] sm:$0xff]  }
 0x37c   :  { %2614 = vmatprep.subr.bf16.mxu0 %v4040_v5  ;;  %2700 = vmatprep.subr.bf16.mxu1 %v4043_v6  ;;  %v4118_v4 = vld [vmem:[%s4549_s11 + $0xe0] sm:$0xff]  }
 0x37d   :  { %v4119_v5 = vld [vmem:[%s4549_s11 + $0x20] sm:$0xff]  }
 0x37e   :  { %v4120_v6 = vld [vmem:[%s4549_s11 + $0xa0] sm:$0xff]  }
 0x37f   :  { %2615 = vmatpush1.bf16.msra.mxu0 %v4038_v7  ;;  %2701 = vmatpush1.bf16.msra.mxu1 %v4041_v8  ;;  %v4121_v7 = vld [vmem:[%s4549_s11 + $0x68] sm:$0xff]  }
 0x380   :  { %2616 = vmatprep.subr.bf16.mxu0 %v4046_v9  ;;  %2702 = vmatprep.subr.bf16.mxu1 %v4049_v10  ;;  %v4122_v8 = vld [vmem:[%s4549_s11 + $0xe8] sm:$0xff]  }
 0x381   :  { %v4123_v9 = vld [vmem:[%s4549_s11 + $0x28] sm:$0xff]  }
 0x382   :  { %v4124_v10 = vld [vmem:[%s4549_s11 + $0xa8] sm:$0xff]  }
 0x383   :  { %2617 = vmatpush1.bf16.msra.mxu0 %v4044_v11  ;;  %2703 = vmatpush1.bf16.msra.mxu1 %v4047_v12  ;;  %v4125_v11 = vld [vmem:[%s4549_s11 + $0x70] sm:$0xff]  }
 0x384   :  { %2618 = vmatprep.subr.bf16.mxu0 %v4052_v13  ;;  %2704 = vmatprep.subr.bf16.mxu1 %v4055_v14  ;;  %v4126_v12 = vld [vmem:[%s4549_s11 + $0xf0] sm:$0xff]  }
 0x385   :  { %v4127_v13 = vld [vmem:[%s4549_s11 + $0x30] sm:$0xff]  }
 0x386   :  { %v4128_v14 = vld [vmem:[%s4549_s11 + $0xb0] sm:$0xff]  }
 0x387   :  { %2619 = vmatpush1.bf16.msra.mxu0 %v4050_v15  ;;  %2705 = vmatpush1.bf16.msra.mxu1 %v4053_v16  ;;  %v4129_v15 = vld [vmem:[%s4549_s11 + $0x78] sm:$0xff]  }
 0x388   :  { %2620 = vmatprep.subr.bf16.mxu0 %v4058_v17  ;;  %2706 = vmatprep.subr.bf16.mxu1 %v4061_v18  ;;  %v4130_v16 = vld [vmem:[%s4549_s11 + $0xf8] sm:$0xff]  }
 0x389   :  { %v4131_v17 = vld [vmem:[%s4549_s11 + $0x38] sm:$0xff]  }
 0x38a   :  { %v4132_v18 = vld [vmem:[%s4549_s11 + $0xb8] sm:$0xff]  }
 0x38b   :  { %2621 = vmatpush1.bf16.msra.mxu0 %v4056_v19  ;;  %2707 = vmatpush1.bf16.msra.mxu1 %v4059_v20  ;;  %v2731_v19 = vld [vmem:[%s4548_s10] sm:$0xf] }
 0x38c   :  { %2622 = vmatprep.subr.bf16.mxu0 %v4064_v21  ;;  %2708 = vmatprep.subr.bf16.mxu1 %v4067_v22  ;;  %v2736_v20 = vrot.slane %v2731_v19, %v4387_v36  ;;  %v2744_v21 = vrot.slane %v2731_v19, %v399_v58  ;;  %v2740_v22 = vrot.slane %v2731_v19, %v4393_v38 }
 0x38f   :  { %2623 = vmatpush1.bf16.msra.mxu0 %v4062_v23  ;;  %2709 = vmatpush1.bf16.msra.mxu1 %v4065_v24  ;;  %v2748_v23 = vrot.slane %v2731_v19, %v403_v60 }
 0x390   :  { %2624 = vmatprep.subr.bf16.mxu0 %v4070_v25  ;;  %2710 = vmatprep.subr.bf16.mxu1 %v4073_v27 }
 0x393   :  { %2625 = vmatpush1.bf16.msra.mxu0 %v4068_v28  ;;  %2711 = vmatpush1.bf16.msra.mxu1 %v4071_v29 }
 0x394   :  { %2626 = vmatprep.subr.bf16.mxu0 %v4076_v30  ;;  %2712 = vmatprep.subr.bf16.mxu1 %v4079_v31 }
 0x397   :  { %2627 = vmatpush1.bf16.msra.mxu0 %v4074_v32  ;;  %2713 = vmatpush1.bf16.msra.mxu1 %v4077_v33 }
 0x398   :  { %2628 = vmatprep.subr.bf16.mxu0 %v4082_v34  ;;  %2714 = vmatprep.subr.bf16.mxu1 %v4085_v37 }
 0x39b   :  { %2629 = vmatpush1.bf16.msra.mxu0 %v4080_v39  ;;  %2715 = vmatpush1.bf16.msra.mxu1 %v4083_v40 }
 0x39c   :  { %2630 = vmatprep.subr.bf16.mxu0 %v4088_v41  ;;  %2716 = vmatprep.subr.bf16.mxu1 %v4091_v42 }
 0x39f   :  { %2631 = vmatpush1.bf16.msra.mxu0 %v4086_v43  ;;  %2717 = vmatpush1.bf16.msra.mxu1 %v4089_v44 }
 0x3a0   :  { %2632 = vmatprep.subr.bf16.mxu0 %v4094_v45  ;;  %2718 = vmatprep.subr.bf16.mxu1 %v4097_v46 }
 0x3a3   :  { %2633 = vmatpush1.bf16.msra.mxu0 %v4092_v47  ;;  %2719 = vmatpush1.bf16.msra.mxu1 %v4095_v48 }
 0x3a4   :  { %3505 = vmatprep.subr.bf16.mxu0 %v4101_v49  ;;  %3527 = vmatprep.subr.bf16.mxu1 %v4102_v50 }
 0x3a6   :  { %2635 = vmatmul.mubr.bf16.vlgmr.msra.gmra.mrb[8].mxu0 %v4098_v26  ;;  %2721 = vmatmul.mubr.bf16.vlgmr.msra.gmra.mrb[8].mxu1 %v4098_v26 }
 0x3a7   :  { %3506 = vmatpush3.bf16.msra.mxu0 %v4103_v51  ;;  %3528 = vmatpush3.bf16.msra.mxu1 %v4104_v52  ;;  %v3470_v52 = vld [vmem:[%s4550_s12] ss:$0 sm:$0xff] }
 0x3a8   :  { %3507 = vmatprep.subr.bf16.mxu0 %v4105_v53  ;;  %3529 = vmatprep.subr.bf16.mxu1 %v4106_v54 }
 0x3ab   :  { %3508 = vmatpush3.bf16.msra.mxu0 %v4107_v55  ;;  %3530 = vmatpush3.bf16.msra.mxu1 %v4108_v56 }
 0x3ac   :  { %3509 = vmatprep.subr.bf16.mxu0 %v4109_v57  ;;  %3531 = vmatprep.subr.bf16.mxu1 %v4110_v59 }
 0x3af   :  { %3510 = vmatpush3.bf16.msra.mxu0 %v4111_v61  ;;  %3532 = vmatpush3.bf16.msra.mxu1 %v4112_v62 }
 0x3b0   :  { %3511 = vmatprep.subr.bf16.mxu0 %v4113_v63  ;;  %3533 = vmatprep.subr.bf16.mxu1 %v4114_v0 }
 0x3b3   :  { %3512 = vmatpush3.bf16.msra.mxu0 %v4115_v1  ;;  %3534 = vmatpush3.bf16.msra.mxu1 %v4116_v2 }
 0x3b4   :  { %3513 = vmatprep.subr.bf16.mxu0 %v4117_v3  ;;  %3535 = vmatprep.subr.bf16.mxu1 %v4118_v4 }
 0x3b7   :  { %3514 = vmatpush3.bf16.msra.mxu0 %v4119_v5  ;;  %3536 = vmatpush3.bf16.msra.mxu1 %v4120_v6 }
 0x3b8   :  { %3515 = vmatprep.subr.bf16.mxu0 %v4121_v7  ;;  %3537 = vmatprep.subr.bf16.mxu1 %v4122_v8 }
 0x3bb   :  { %3516 = vmatpush3.bf16.msra.mxu0 %v4123_v9  ;;  %3538 = vmatpush3.bf16.msra.mxu1 %v4124_v10 }
 0x3bc   :  { %3517 = vmatprep.subr.bf16.mxu0 %v4125_v11  ;;  %3539 = vmatprep.subr.bf16.mxu1 %v4126_v12 }
 0x3bf   :  { %3518 = vmatpush3.bf16.msra.mxu0 %v4127_v13  ;;  %3540 = vmatpush3.bf16.msra.mxu1 %v4128_v14 }
 0x3c0   :  { %3519 = vmatprep.subr.bf16.mxu0 %v4129_v15  ;;  %3541 = vmatprep.subr.bf16.mxu1 %v4130_v16 }
 0x3c3   :  { %3520 = vmatpush3.bf16.msra.mxu0 %v4131_v17  ;;  %3542 = vmatpush3.bf16.msra.mxu1 %v4132_v18 }
 0x479   :  { %v2636_v24 = vpop.f32.mrb[8].mxu0  ;;  %v2722_v25 = vpop.f32.mrb[8].mxu1 }
 0x47a   :  { %v2753_v27 = vadd.f32 %v2736_v20, %v2636_v24  ;;  %v2755_v28 = vadd.f32 %v2744_v21, %v2722_v25  ;;  %v2638_v29 = vpop.f32.mrb[9].mxu0  ;;  %v2724_v30 = vpop.f32.mrb[9].mxu1 }
 0x47b   :  { %v2754_v31 = vadd.f32 %v2740_v22, %v2638_v29  ;;  %v2756_v32 = vadd.f32 %v2748_v23, %v2724_v30  ;;  %v2640_v33 = vpop.f32.mrb[10].mxu0  ;;  %v2726_v34 = vpop.f32.mrb[10].mxu1 }
 0x47c   :  { %v2757_v37 = vadd.f32 %v2736_v20, %v2640_v33  ;;  %v2759_v36 = vadd.f32 %v2744_v21, %v2726_v34  ;;  %v2642_v39 = vpop.f32.mrb[11].mxu0  ;;  %v2728_v40 = vpop.f32.mrb[11].mxu1  ;;  %v2761_v38 = vmax.f32 %v2753_v27, 0.0  ;;  %v2763_v42 = vmax.f32 %v2755_v28, 0.0 }
 0x47d   :  { %v2758_v58 = vadd.f32 %v2740_v22, %v2642_v39  ;;  %v2760_v41 = vadd.f32 %v2748_v23, %v2728_v40  ;;  %v2762_v43 = vmax.f32 %v2754_v31, 0.0  ;;  %v2764_v44 = vmax.f32 %v2756_v32, 0.0 }
 0x47e   :  { %v2765_v35 = vmax.f32 %v2757_v37, 0.0  ;;  %v2767_v60 = vmax.f32 %v2759_v36, 0.0 }
 0x47f   :  { %v2766_v45 = vmax.f32 %v2758_v58, 0.0  ;;  %v2768_v46 = vmax.f32 %v2760_v41, 0.0 }
 0x480   :  { %v2769_v47 = vpack.c.bf16 %v2765_v35, %v2761_v38  ;;  %v2771_v48 = vpack.c.bf16 %v2767_v60, %v2763_v42 }
 0x481   :  { %v2770_v49 = vpack.c.bf16 %v2766_v45, %v2762_v43  ;;  %v2772_v50 = vpack.c.bf16 %v2768_v46, %v2764_v44 }
 0x483   :  { %3068 = vmatprep.mubr.bf16.mxu0 %v2770_v49  ;;  %3109 = vmatprep.mubr.bf16.mxu1 %v2772_v50 }
 0x484   :  { %3069 = vmatmul.mubr.bf16.vlgmr.msra.gmra.mrb[12].mxu0 %v2769_v47  ;;  %3110 = vmatmul.mubr.bf16.vlgmr.msra.gmra.mrb[12].mxu1 %v2771_v48 }
 0x557   :  { %v3521_v26 = vpop.f32.mrb[12].mxu0  ;;  %v3543_v51 = vpop.f32.mrb[12].mxu1 }
 0x558   :  { %v3522_v53 = vpop.f32.mrb[13].mxu0  ;;  %v3544_v54 = vpop.f32.mrb[13].mxu1 }
 0x559   :  { %v3523_v55 = vadd.f32 %v3522_v53, %v3521_v26  ;;  %v3545_v56 = vadd.f32 %v3544_v54, %v3543_v51  ;;  %v3524_v57 = vpop.f32.mrb[14].mxu0  ;;  %v3546_v59 = vpop.f32.mrb[14].mxu1 }
 0x55a   :  { %v3525_v61 = vpop.f32.mrb[15].mxu0  ;;  %v3547_v62 = vpop.f32.mrb[15].mxu1 }
 0x55b   :  { %v3071_v63 = vadd.f32 %v3523_v55, %v3470_v52  ;;  %v3526_v0 = vadd.f32 %v3525_v61, %v3524_v57  ;;  %v3548_v1 = vadd.f32 %v3547_v62, %v3546_v59 }
 0x55d   :  { %v3112_v2 = vadd.f32 %v3545_v56, %v3071_v63  ;;  %v3074_v3 = vadd.f32 %v3526_v0, %v3470_v52 }
 0x55f   :  { %3118 = vst [vmem:[%s4551_s13] sm:$0xff] %v3112_v2  ;;  %v3115_v4 = vadd.f32 %v3548_v1, %v3074_v3 }
 0x561   :  { %3119 = vst [vmem:[%s4551_s13 + $0x8] sm:$0xff] %v3115_v4 }
 0x562   :  { %3124 = vsyncpa [#allocation3], 1 }
 0x563   :  { %3125 = vsyncpa [#allocation5], 1 }
 0x564   :  { %3126 = vsyncpa [#allocation8], 1 }

</bundles_post_ra>
